<compile_context>
chip_gen: v6e
topology: v6e:2x2x1
jax: 0.10.0
libtpu: 0.0.40
codegen_flags: <defaults>
</compile_context>

<pallas_src>
import functools

import jax
import jax.numpy as jnp
from jax.experimental import pallas as pl
from jax.experimental.pallas import tpu as pltpu

D_IN = 28 * 28          # 784
D_IN_PAD = 896          # next multiple of 128
D_HID = 512
D_OUT = 10
D_OUT_PAD = 128         # lane-dense padded output width


def _round_up(x, m):
    return ((x + m - 1) // m) * m


def mlp_kernel(x_ref, w1_ref, b1_ref, w2_ref, b2_ref, w3_ref, b3_ref, o_ref):
    # x_ref: (TB, 896) f32        w1: (896, 512) bf16   b1: (1, 512) f32
    # w2: (512, 512) bf16         b2: (1, 512) f32
    # w3: (512, 128) bf16 (cols >=10 are zero)   b3: (1, 128) f32
    # o_ref: (TB, 128) f32
    x = x_ref[...].astype(jnp.bfloat16)
    h = jnp.dot(x, w1_ref[...], preferred_element_type=jnp.float32)
    h = jnp.maximum(h + b1_ref[...], 0.0)
    h = jnp.dot(h.astype(jnp.bfloat16), w2_ref[...],
                preferred_element_type=jnp.float32)
    h = jnp.maximum(h + b2_ref[...], 0.0)
    logits = jnp.dot(h.astype(jnp.bfloat16), w3_ref[...],
                     preferred_element_type=jnp.float32)
    o_ref[...] = logits + b3_ref[...]


@functools.partial(jax.jit, static_argnames=("batch_tile",))
def neural_network_forward(x, params, *, batch_tile=512):
    """x: (B, 28, 28) float32 -> logits (B, 10) float32."""
    w1, b1, w2, b2, w3, b3 = params
    B = x.shape[0]

    # nn.Flatten() + K padding 784 -> 896.
    x_flat = x.reshape(B, D_IN).astype(jnp.float32)
    x_flat = jnp.pad(x_flat, ((0, 0), (0, D_IN_PAD - D_IN)))

    # Batch tile: multiple of 8 (sublane), capped by batch_tile; pad B up.
    tb = min(batch_tile, _round_up(B, 8))
    b_pad = _round_up(B, tb)
    if b_pad != B:
        x_flat = jnp.pad(x_flat, ((0, b_pad - B), (0, 0)))
    grid = (b_pad // tb,)

    # Weight/bias blocks use a constant index_map -> resident across the grid.
    const2d = lambda i: (0, 0)
    in_specs = [
        pl.BlockSpec((tb, D_IN_PAD), lambda i: (i, 0)),        # x tile
        pl.BlockSpec((D_IN_PAD, D_HID), const2d),              # w1
        pl.BlockSpec((1, D_HID), const2d),                     # b1
        pl.BlockSpec((D_HID, D_HID), const2d),                 # w2
        pl.BlockSpec((1, D_HID), const2d),                     # b2
        pl.BlockSpec((D_HID, D_OUT_PAD), const2d),             # w3 (padded)
        pl.BlockSpec((1, D_OUT_PAD), const2d),                 # b3 (padded)
    ]
    out_specs = pl.BlockSpec((tb, D_OUT_PAD), lambda i: (i, 0))

    weight_bytes = (
        w1.size * w1.dtype.itemsize + w2.size * w2.dtype.itemsize
        + w3.size * w3.dtype.itemsize
        + b1.size * 4 + b2.size * 4 + b3.size * 4)
    bytes_accessed = (b_pad * D_IN_PAD * 4          # x in
                      + weight_bytes                # weights/biases in
                      + b_pad * D_OUT_PAD * 4)      # logits out
    flops = 2 * B * (D_IN * D_HID + D_HID * D_HID + D_HID * D_OUT)

    out = pl.pallas_call(
        mlp_kernel,
        out_shape=jax.ShapeDtypeStruct((b_pad, D_OUT_PAD), jnp.float32),
        grid=grid,
        in_specs=in_specs,
        out_specs=out_specs,
        compiler_params=pltpu.CompilerParams(
            dimension_semantics=("parallel",),
            vmem_limit_bytes=32 * 1024 * 1024,
        ),
        cost_estimate=pl.CostEstimate(
            flops=flops, transcendentals=0, bytes_accessed=bytes_accessed),
    )(x_flat, w1, b1, w2, b2, w3, b3)

    return out[:B, :D_OUT]


def init_params(key):
    """PyTorch nn.Linear default init: W, b ~ U(-1/sqrt(fan_in), 1/sqrt(fan_in)).
    Weights stored transposed to (in, out), padded to lane-aligned shapes
    (zero padding), and cast to bfloat16; biases kept float32."""
    dims = [(D_IN, D_HID), (D_HID, D_HID), (D_HID, D_OUT)]
    pad_shapes = [(D_IN_PAD, D_HID), (D_HID, D_HID), (D_HID, D_OUT_PAD)]
    params = []
    for (fan_in, fan_out), (pi, po) in zip(dims, pad_shapes):
        key, kw, kb = jax.random.split(key, 3)
        bound = 1.0 / jnp.sqrt(jnp.float32(fan_in))
        w = jax.random.uniform(kw, (fan_in, fan_out), jnp.float32, -bound, bound)
        b = jax.random.uniform(kb, (1, fan_out), jnp.float32, -bound, bound)
        # Zero-pad to the aligned kernel shapes (rows for K pad, cols for N pad).
        w = jnp.pad(w, ((0, pi - fan_in), (0, po - fan_out)))
        b = jnp.pad(b, ((0, 0), (0, po - fan_out)))
        params.extend([w.astype(jnp.bfloat16), b])
    return tuple(params)


def ref_forward(x, params):
    """Pure-JAX reference mirroring the kernel's bf16-input / f32-accumulate math."""
    w1, b1, w2, b2, w3, b3 = params
    B = x.shape[0]
    xf = jnp.pad(x.reshape(B, D_IN), ((0, 0), (0, D_IN_PAD - D_IN)))
    h = jnp.dot(xf.astype(jnp.bfloat16), w1, preferred_element_type=jnp.float32)
    h = jnp.maximum(h + b1, 0.0)
    h = jnp.dot(h.astype(jnp.bfloat16), w2, preferred_element_type=jnp.float32)
    h = jnp.maximum(h + b2, 0.0)
    logits = jnp.dot(h.astype(jnp.bfloat16), w3,
                     preferred_element_type=jnp.float32) + b3
    return logits[:, :D_OUT]


if __name__ == "__main__":
    key = jax.random.PRNGKey(0)
    k_params, k_x = jax.random.split(key)
    params = init_params(k_params)

    B = 8
    x = jax.random.normal(k_x, (B, 28, 28), dtype=jnp.float32)

    logits = neural_network_forward(x, params)
    logits = jax.block_until_ready(logits)

    ref = ref_forward(x, params)
    assert logits.shape == (B, D_OUT)
    assert jnp.allclose(logits, ref, atol=1e-2, rtol=1e-2), (
        float(jnp.max(jnp.abs(logits - ref))))

    print("KERNEL_OK")
</pallas_src>

<mosaic_0001>
module attributes {stable_mosaic.version = 11 : i64} {
  func.func @mlp_kernel(%arg0: i32, %arg1: memref<8x896xf32, #tpu.memory_space<vmem>>, %arg2: memref<896x512xbf16, #tpu.memory_space<vmem>>, %arg3: memref<1x512xf32, #tpu.memory_space<vmem>>, %arg4: memref<512x512xbf16, #tpu.memory_space<vmem>>, %arg5: memref<1x512xf32, #tpu.memory_space<vmem>>, %arg6: memref<512x128xbf16, #tpu.memory_space<vmem>>, %arg7: memref<1x128xf32, #tpu.memory_space<vmem>>, %arg8: memref<8x128xf32, #tpu.memory_space<vmem>>) attributes {dimension_semantics = [#tpu.dimension_semantics<parallel>], iteration_bounds = array<i64: 1>, scalar_prefetch = 0 : i64, scratch_operands = 0 : i64, tpu.core_type = #tpu.core_type<tc>, window_params = [{transform_indices = @transform_0, window_bounds = array<i64: 8, 896>}, {pipeline_mode = #tpu.pipeline_mode<synchronous>, transform_indices = @transform_1, window_bounds = array<i64: 896, 512>}, {pipeline_mode = #tpu.pipeline_mode<synchronous>, transform_indices = @transform_2, window_bounds = array<i64: 1, 512>}, {pipeline_mode = #tpu.pipeline_mode<synchronous>, transform_indices = @transform_3, window_bounds = array<i64: 512, 512>}, {pipeline_mode = #tpu.pipeline_mode<synchronous>, transform_indices = @transform_4, window_bounds = array<i64: 1, 512>}, {pipeline_mode = #tpu.pipeline_mode<synchronous>, transform_indices = @transform_5, window_bounds = array<i64: 512, 128>}, {pipeline_mode = #tpu.pipeline_mode<synchronous>, transform_indices = @transform_6, window_bounds = array<i64: 1, 128>}, {transform_indices = @transform_7, window_bounds = array<i64: 8, 128>}]} {
    %c0 = arith.constant 0 : index
    %c0_0 = arith.constant 0 : index
    %0 = vector.load %arg1[%c0, %c0_0] : memref<8x896xf32, #tpu.memory_space<vmem>>, vector<8x896xf32>
    %1 = arith.truncf %0 : vector<8x896xf32> to vector<8x896xbf16>
    %c0_1 = arith.constant 0 : index
    %c0_2 = arith.constant 0 : index
    %2 = vector.load %arg2[%c0_1, %c0_2] : memref<896x512xbf16, #tpu.memory_space<vmem>>, vector<896x512xbf16>
    %cst = arith.constant dense<0.000000e+00> : vector<8x512xf32>
    %3 = tpu.matmul %1, %2, %cst {dimension_numbers = #tpu.dot_dimension_numbers<[1], [0], [0], [1], [0, 0, 1, 1], [], []>} : vector<8x896xbf16>, vector<896x512xbf16>, vector<8x512xf32> -> vector<8x512xf32>
    %c0_3 = arith.constant 0 : index
    %c0_4 = arith.constant 0 : index
    %4 = vector.load %arg3[%c0_3, %c0_4] : memref<1x512xf32, #tpu.memory_space<vmem>>, vector<1x512xf32>
    %5 = vector.broadcast %4 : vector<1x512xf32> to vector<8x512xf32>
    %6 = arith.addf %3, %5 : vector<8x512xf32>
    %cst_5 = arith.constant 0.000000e+00 : f32
    %7 = vector.broadcast %cst_5 : f32 to vector<8x512xf32>
    %8 = arith.maximumf %6, %7 : vector<8x512xf32>
    %9 = arith.truncf %8 : vector<8x512xf32> to vector<8x512xbf16>
    %c0_6 = arith.constant 0 : index
    %c0_7 = arith.constant 0 : index
    %10 = vector.load %arg4[%c0_6, %c0_7] : memref<512x512xbf16, #tpu.memory_space<vmem>>, vector<512x512xbf16>
    %cst_8 = arith.constant dense<0.000000e+00> : vector<8x512xf32>
    %11 = tpu.matmul %9, %10, %cst_8 {dimension_numbers = #tpu.dot_dimension_numbers<[1], [0], [0], [1], [0, 0, 1, 1], [], []>} : vector<8x512xbf16>, vector<512x512xbf16>, vector<8x512xf32> -> vector<8x512xf32>
    %c0_9 = arith.constant 0 : index
    %c0_10 = arith.constant 0 : index
    %12 = vector.load %arg5[%c0_9, %c0_10] : memref<1x512xf32, #tpu.memory_space<vmem>>, vector<1x512xf32>
    %13 = vector.broadcast %12 : vector<1x512xf32> to vector<8x512xf32>
    %14 = arith.addf %11, %13 : vector<8x512xf32>
    %cst_11 = arith.constant 0.000000e+00 : f32
    %15 = vector.broadcast %cst_11 : f32 to vector<8x512xf32>
    %16 = arith.maximumf %14, %15 : vector<8x512xf32>
    %17 = arith.truncf %16 : vector<8x512xf32> to vector<8x512xbf16>
    %c0_12 = arith.constant 0 : index
    %c0_13 = arith.constant 0 : index
    %18 = vector.load %arg6[%c0_12, %c0_13] : memref<512x128xbf16, #tpu.memory_space<vmem>>, vector<512x128xbf16>
    %cst_14 = arith.constant dense<0.000000e+00> : vector<8x128xf32>
    %19 = tpu.matmul %17, %18, %cst_14 {dimension_numbers = #tpu.dot_dimension_numbers<[1], [0], [0], [1], [0, 0, 1, 1], [], []>} : vector<8x512xbf16>, vector<512x128xbf16>, vector<8x128xf32> -> vector<8x128xf32>
    %c0_15 = arith.constant 0 : index
    %c0_16 = arith.constant 0 : index
    %20 = vector.load %arg7[%c0_15, %c0_16] : memref<1x128xf32, #tpu.memory_space<vmem>>, vector<1x128xf32>
    %21 = vector.broadcast %20 : vector<1x128xf32> to vector<8x128xf32>
    %22 = arith.addf %19, %21 : vector<8x128xf32>
    %c0_17 = arith.constant 0 : index
    %c0_18 = arith.constant 0 : index
    %23 = vector.load %arg8[%c0_17, %c0_18] : memref<8x128xf32, #tpu.memory_space<vmem>>, vector<8x128xf32>
    tpu.vector_store %arg8[%c0_17, %c0_18], %22 {strides = array<i32>} : memref<8x128xf32, #tpu.memory_space<vmem>>, vector<8x128xf32>,
    return
  }
  func.func @transform_0(%arg0: i32) -> (i32, i32) {
    %c0_i32 = arith.constant 0 : i32
    %c0_i32_0 = arith.constant 0 : i32
    return %arg0, %c0_i32 : i32, i32
  }
  func.func @transform_1(%arg0: i32) -> (i32, i32) {
    %c0_i32 = arith.constant 0 : i32
    %c0_i32_0 = arith.constant 0 : i32
    %c0_i32_1 = arith.constant 0 : i32
    return %c0_i32, %c0_i32_0 : i32, i32
  }
  func.func @transform_2(%arg0: i32) -> (i32, i32) {
    %c0_i32 = arith.constant 0 : i32
    %c0_i32_0 = arith.constant 0 : i32
    %c0_i32_1 = arith.constant 0 : i32
    return %c0_i32, %c0_i32_0 : i32, i32
  }
  func.func @transform_3(%arg0: i32) -> (i32, i32) {
    %c0_i32 = arith.constant 0 : i32
    %c0_i32_0 = arith.constant 0 : i32
    %c0_i32_1 = arith.constant 0 : i32
    return %c0_i32, %c0_i32_0 : i32, i32
  }
  func.func @transform_4(%arg0: i32) -> (i32, i32) {
    %c0_i32 = arith.constant 0 : i32
    %c0_i32_0 = arith.constant 0 : i32
    %c0_i32_1 = arith.constant 0 : i32
    return %c0_i32, %c0_i32_0 : i32, i32
  }
  func.func @transform_5(%arg0: i32) -> (i32, i32) {
    %c0_i32 = arith.constant 0 : i32
    %c0_i32_0 = arith.constant 0 : i32
    %c0_i32_1 = arith.constant 0 : i32
    return %c0_i32, %c0_i32_0 : i32, i32
  }
  func.func @transform_6(%arg0: i32) -> (i32, i32) {
    %c0_i32 = arith.constant 0 : i32
    %c0_i32_0 = arith.constant 0 : i32
    %c0_i32_1 = arith.constant 0 : i32
    return %c0_i32, %c0_i32_0 : i32, i32
  }
  func.func @transform_7(%arg0: i32) -> (i32, i32) {
    %c0_i32 = arith.constant 0 : i32
    %c0_i32_0 = arith.constant 0 : i32
    return %arg0, %c0_i32 : i32, i32
  }
}

</mosaic_0001>

<bundles_post_ra>
// kernel: neural_network_forward.1
= control target key start
LH: loop header
LB: loop body
LE: loop exit
PB: predicated region body
PF: predicated region fallthrough
CT: control target
= control target key end

     0   :  { %12 = vsyncpa [#allocation3], 0  ;;  %s4414_s0 = inlined_call_operand.vmem [shape: f32[8,896], index: 0, kind: input, shape index: {}]   ;;  %s4415_s1 = inlined_call_operand.hbm [shape: bf16[896,512], index: 1, kind: input, shape index: {}]   ;;  %s4416_s2 = inlined_call_operand.vmem [shape: f32[1,512], index: 2, kind: input, shape index: {}]   ;;  %s4417_s3 = inlined_call_operand.hbm [shape: bf16[512,512], index: 3, kind: input, shape index: {}]   ;;  %s4418_s4 = inlined_call_operand.vmem [shape: f32[1,512], index: 4, kind: input, shape index: {}]   ;;  %s4419_s5 = inlined_call_operand.vmem [shape: bf16[512,128], index: 5, kind: input, shape index: {}]   ;;  %s4420_s6 = inlined_call_operand.vmem [shape: f32[1,128], index: 6, kind: input, shape index: {}]   ;;  %s4421_s7 = inlined_call_operand.hbm [shape: f32[8,128], index: 7, kind: output, shape index: {}]  }
   0x1   :  { %13 = vsyncpa [#allocation6], 0 }
   0x2   :  { %14 = vsyncpa [#allocation4], 0  ;;  %s4155_s24 = smov [#allocation2]  }
   0x3   :  { %s22_s25 = sshll.u32 %s4155_s24, 4  ;;  %s23_s25 = int_to_ptr.vmem [resolvable:$true] %s22_s25 }
   0x4   :  { %s4097_s26 = scalar_lea.vmem %s23_s25, 28672  ;;  %p4102_p1 = scmp.lt.s32.totalorder %s23_s25, %s23_s25 }
   0x5   :  { %p4098_p0 = scmp.ne.s32.totalorder %s23_s25, %s4097_s26  ;;  %p4103_p2 = scmp.lt.s32.totalorder %s4097_s26, %s4097_s26 }
   0x7   :  { %p4104_p3 = por %p4103_p2, %p4102_p1 }
   0x9   :  { %p4105_p4 = pnand %p4104_p3, %p4098_p0 }
   0xb   :  { %4108 = shalt.err (!%p4105_p4)
}
   0xc   :  { %s4156_s27 = smov 256   ;;  %s4157_s28 = smov 16  }
   0xd   :  { %28 = dma.hbm_to_vmem [thread:$0]  %s4415_s1, 28672, %s23_s25, [#allocation3], %s4156_s27, %s4156_s27, %s4157_s28  }
   0xe   :  { %s4158_s8 = smov [#allocation5]  }
   0xf   :  { %s36_s9 = sshll.u32 %s4158_s8, 4  ;;  %s37_s9 = int_to_ptr.vmem [resolvable:$true] %s36_s9 }
  0x10   :  { %s4117_s10 = scalar_lea.vmem %s37_s9, 16384  ;;  %p4122_p6 = scmp.lt.s32.totalorder %s37_s9, %s37_s9 }
  0x11   :  { %p4118_p5 = scmp.ne.s32.totalorder %s37_s9, %s4117_s10  ;;  %p4123_p7 = scmp.lt.s32.totalorder %s4117_s10, %s4117_s10 }
  0x13   :  { %p4124_p8 = por %p4123_p7, %p4122_p6 }
  0x15   :  { %p4125_p9 = pnand %p4124_p8, %p4118_p5 }
  0x17   :  { %4128 = shalt.err (!%p4125_p9)
}
  0x18   :  { %42 = dma.hbm_to_vmem [thread:$0]  %s4417_s3, 16384, %s37_s9, [#allocation6], %s4156_s27, %s4156_s27, %s4157_s28  }
  0x19   :  { %4149 = dma.done.wait [#allocation3], 28672  }
  0x1a   :  { %4150 = vsyncadd [#allocation3], 4294938624 }
  0x1b   :  { %4151 = dma.done.wait [#allocation6], 16384  }
  0x1c   :  { %4152 = vsyncadd [#allocation6], 4294950912  ;;  %v3529_v0 = vld [vmem:[#allocation2 + $0xe4] ss:$16 sps:$4 sm:$0xff]   ;;  %v3533_v2 = vld [vmem:[#allocation2 + $0xe0] ss:$16 sps:$4 sm:$0xff]  }
  0x1d   :  { %v3531_v1 = vld [vmem:[#allocation2 + $0x2e4] ss:$16 sps:$4 sm:$0xff]   ;;  %1436 = vmatprep.subr.bf16.mxu0 %v3529_v0  ;;  %v3534_v3 = vld [vmem:[#allocation2 + $0x2e0] ss:$16 sps:$4 sm:$0xff]   ;;  %v57_v46 = vld [vmem:[%s4414_s0 + $0x8] sm:$0xff]  ;;  %s4160_s3 = smov [#allocation7]  }
  0x1e   :  { %1477 = vmatprep.subr.bf16.mxu1 %v3531_v1  ;;  %v3535_v4 = vld [vmem:[#allocation2 + $0xc4] ss:$16 sps:$4 sm:$0xff]   ;;  %1437 = vmatpush1.bf16.msra.mxu0 %v3533_v2  ;;  %v3539_v6 = vld [vmem:[#allocation2 + $0xc0] ss:$16 sps:$4 sm:$0xff]   ;;  %v4210_v49 = vpack.c.bf16 %v57_v46, %v57_v46  ;;  %v59_v50 = vld [vmem:[%s4414_s0 + $0x18] sm:$0xff]  ;;  %s3084_s13 = sshll.u32 %s4160_s3, 4  ;;  %s3085_s13 = int_to_ptr.vmem [resolvable:$true] %s3084_s13 }
  0x1f   :  { %1478 = vmatpush1.bf16.msra.mxu1 %v3534_v3  ;;  %v3537_v5 = vld [vmem:[#allocation2 + $0x2c4] ss:$16 sps:$4 sm:$0xff]   ;;  %1438 = vmatprep.subr.bf16.mxu0 %v3535_v4  ;;  %v3540_v7 = vld [vmem:[#allocation2 + $0x2c0] ss:$16 sps:$4 sm:$0xff]   ;;  %v4215_v52 = vpack.c.bf16 %v59_v50, %v59_v50  ;;  %s4129_s14 = scalar_lea.vmem %s3085_s13, 128  ;;  %p4134_p11 = scmp.lt.s32.totalorder %s3085_s13, %s3085_s13 }
  0x20   :  { %1479 = vmatprep.subr.bf16.mxu1 %v3537_v5  ;;  %v3541_v8 = vld [vmem:[#allocation2 + $0xa4] ss:$16 sps:$4 sm:$0xff]   ;;  %v3545_v10 = vld [vmem:[#allocation2 + $0xa0] ss:$16 sps:$4 sm:$0xff]   ;;  %1468 = vmatprep.mubr.bf16.mxu0 %v4210_v49  ;;  %p4130_p10 = scmp.ne.s32.totalorder %s3085_s13, %s4129_s14  ;;  %p4135_p12 = scmp.lt.s32.totalorder %s4129_s14, %s4129_s14 }
  0x21   :  { %v3543_v9 = vld [vmem:[#allocation2 + $0x2a4] ss:$16 sps:$4 sm:$0xff]   ;;  %v3546_v11 = vld [vmem:[#allocation2 + $0x2a0] ss:$16 sps:$4 sm:$0xff]   ;;  %1509 = vmatprep.mubr.bf16.mxu1 %v4215_v52 }
  0x22   :  { %1439 = vmatpush1.bf16.msra.mxu0 %v3539_v6  ;;  %v3547_v12 = vld [vmem:[#allocation2 + $0x84] ss:$16 sps:$4 sm:$0xff]   ;;  %v3551_v14 = vld [vmem:[#allocation2 + $0x80] ss:$16 sps:$4 sm:$0xff]   ;;  %p4136_p13 = por %p4135_p12, %p4134_p11 }
  0x23   :  { %1480 = vmatpush1.bf16.msra.mxu1 %v3540_v7  ;;  %1440 = vmatprep.subr.bf16.mxu0 %v3541_v8  ;;  %v3549_v13 = vld [vmem:[#allocation2 + $0x284] ss:$16 sps:$4 sm:$0xff]   ;;  %v3552_v15 = vld [vmem:[#allocation2 + $0x280] ss:$16 sps:$4 sm:$0xff]  }
  0x24   :  { %1481 = vmatprep.subr.bf16.mxu1 %v3543_v9  ;;  %v3553_v16 = vld [vmem:[#allocation2 + $0x64] ss:$16 sps:$4 sm:$0xff]   ;;  %v3557_v18 = vld [vmem:[#allocation2 + $0x60] ss:$16 sps:$4 sm:$0xff]   ;;  %p4137_p0 = pnand %p4136_p13, %p4130_p10 }
  0x25   :  { %v3555_v17 = vld [vmem:[#allocation2 + $0x264] ss:$16 sps:$4 sm:$0xff]   ;;  %v3558_v19 = vld [vmem:[#allocation2 + $0x260] ss:$16 sps:$4 sm:$0xff]  }
  0x26   :  { %1441 = vmatpush1.bf16.msra.mxu0 %v3545_v10  ;;  %v3559_v20 = vld [vmem:[#allocation2 + $0x44] ss:$16 sps:$4 sm:$0xff]   ;;  %v3563_v22 = vld [vmem:[#allocation2 + $0x40] ss:$16 sps:$4 sm:$0xff]  }
  0x27   :  { %1482 = vmatpush1.bf16.msra.mxu1 %v3546_v11  ;;  %1442 = vmatprep.subr.bf16.mxu0 %v3547_v12  ;;  %v3561_v21 = vld [vmem:[#allocation2 + $0x244] ss:$16 sps:$4 sm:$0xff]   ;;  %v3564_v23 = vld [vmem:[#allocation2 + $0x240] ss:$16 sps:$4 sm:$0xff]  }
  0x28   :  { %1483 = vmatprep.subr.bf16.mxu1 %v3549_v13  ;;  %v3565_v24 = vld [vmem:[#allocation2 + $0x24] ss:$16 sps:$4 sm:$0xff]   ;;  %v3569_v26 = vld [vmem:[#allocation2 + $0x20] ss:$16 sps:$4 sm:$0xff]  }
  0x29   :  { %v3567_v25 = vld [vmem:[#allocation2 + $0x224] ss:$16 sps:$4 sm:$0xff]   ;;  %v3570_v27 = vld [vmem:[#allocation2 + $0x220] ss:$16 sps:$4 sm:$0xff]  }
  0x2a   :  { %1443 = vmatpush1.bf16.msra.mxu0 %v3551_v14  ;;  %v3571_v28 = vld [vmem:[#allocation2 + $0x4] ss:$16 sps:$4 sm:$0xff]   ;;  %v3575_v30 = vld [vmem:[#allocation2] ss:$16 sps:$4 sm:$0xff]  }
  0x2b   :  { %1484 = vmatpush1.bf16.msra.mxu1 %v3552_v15  ;;  %1444 = vmatprep.subr.bf16.mxu0 %v3553_v16  ;;  %v3573_v29 = vld [vmem:[#allocation2 + $0x204] ss:$16 sps:$4 sm:$0xff]   ;;  %v3576_v31 = vld [vmem:[#allocation2 + $0x200] ss:$16 sps:$4 sm:$0xff]  }
  0x2c   :  { %1485 = vmatprep.subr.bf16.mxu1 %v3555_v17  ;;  %v3577_v32 = vld [vmem:[#allocation2 + $0x1e4] ss:$16 sps:$4 sm:$0xff]   ;;  %v3581_v34 = vld [vmem:[#allocation2 + $0x1e0] ss:$16 sps:$4 sm:$0xff]  }
  0x2d   :  { %v3579_v33 = vld [vmem:[#allocation2 + $0x3e4] ss:$16 sps:$4 sm:$0xff]   ;;  %v3582_v35 = vld [vmem:[#allocation2 + $0x3e0] ss:$16 sps:$4 sm:$0xff]  }
  0x2e   :  { %1445 = vmatpush1.bf16.msra.mxu0 %v3557_v18  ;;  %v3583_v36 = vld [vmem:[#allocation2 + $0x1c4] ss:$16 sps:$4 sm:$0xff]   ;;  %v3587_v38 = vld [vmem:[#allocation2 + $0x1c0] ss:$16 sps:$4 sm:$0xff]   ;;  %v4159_v18 = vmov 0  }
  0x2f   :  { %1486 = vmatpush1.bf16.msra.mxu1 %v3558_v19  ;;  %1446 = vmatprep.subr.bf16.mxu0 %v3559_v20  ;;  %v3585_v37 = vld [vmem:[#allocation2 + $0x3c4] ss:$16 sps:$4 sm:$0xff]   ;;  %v3588_v39 = vld [vmem:[#allocation2 + $0x3c0] ss:$16 sps:$4 sm:$0xff]  }
  0x30   :  { %1487 = vmatprep.subr.bf16.mxu1 %v3561_v21  ;;  %v3589_v40 = vld [vmem:[#allocation2 + $0x1a4] ss:$16 sps:$4 sm:$0xff]   ;;  %v3593_v42 = vld [vmem:[#allocation2 + $0x1a0] ss:$16 sps:$4 sm:$0xff]  }
  0x31   :  { %v3591_v41 = vld [vmem:[#allocation2 + $0x3a4] ss:$16 sps:$4 sm:$0xff]   ;;  %v3594_v43 = vld [vmem:[#allocation2 + $0x3a0] ss:$16 sps:$4 sm:$0xff]  }
  0x32   :  { %1447 = vmatpush1.bf16.msra.mxu0 %v3563_v22  ;;  %v3595_v44 = vld [vmem:[#allocation2 + $0x184] ss:$16 sps:$4 sm:$0xff]   ;;  %v3599_v47 = vld [vmem:[#allocation2 + $0x180] ss:$16 sps:$4 sm:$0xff]  }
  0x33   :  { %1488 = vmatpush1.bf16.msra.mxu1 %v3564_v23  ;;  %1448 = vmatprep.subr.bf16.mxu0 %v3565_v24  ;;  %v3597_v45 = vld [vmem:[#allocation2 + $0x384] ss:$16 sps:$4 sm:$0xff]   ;;  %v3600_v48 = vld [vmem:[#allocation2 + $0x380] ss:$16 sps:$4 sm:$0xff]  }
  0x34   :  { %1489 = vmatprep.subr.bf16.mxu1 %v3567_v25  ;;  %v3601_v51 = vld [vmem:[#allocation2 + $0x164] ss:$16 sps:$4 sm:$0xff]   ;;  %v3605_v54 = vld [vmem:[#allocation2 + $0x160] ss:$16 sps:$4 sm:$0xff]  }
  0x35   :  { %v3603_v53 = vld [vmem:[#allocation2 + $0x364] ss:$16 sps:$4 sm:$0xff]   ;;  %v3606_v55 = vld [vmem:[#allocation2 + $0x360] ss:$16 sps:$4 sm:$0xff]  }
  0x36   :  { %1449 = vmatpush1.bf16.msra.mxu0 %v3569_v26  ;;  %v3607_v56 = vld [vmem:[#allocation2 + $0x144] ss:$16 sps:$4 sm:$0xff]   ;;  %v3611_v58 = vld [vmem:[#allocation2 + $0x140] ss:$16 sps:$4 sm:$0xff]  }
  0x37   :  { %1490 = vmatpush1.bf16.msra.mxu1 %v3570_v27  ;;  %1450 = vmatprep.subr.bf16.mxu0 %v3571_v28  ;;  %v3609_v57 = vld [vmem:[#allocation2 + $0x344] ss:$16 sps:$4 sm:$0xff]   ;;  %v3612_v59 = vld [vmem:[#allocation2 + $0x340] ss:$16 sps:$4 sm:$0xff]  }
  0x38   :  { %1491 = vmatprep.subr.bf16.mxu1 %v3573_v29  ;;  %v3613_v60 = vld [vmem:[#allocation2 + $0x124] ss:$16 sps:$4 sm:$0xff]   ;;  %v3617_v62 = vld [vmem:[#allocation2 + $0x120] ss:$16 sps:$4 sm:$0xff]  }
  0x39   :  { %v3615_v61 = vld [vmem:[#allocation2 + $0x324] ss:$16 sps:$4 sm:$0xff]   ;;  %v3618_v63 = vld [vmem:[#allocation2 + $0x320] ss:$16 sps:$4 sm:$0xff]  }
  0x3a   :  { %1451 = vmatpush1.bf16.msra.mxu0 %v3575_v30  ;;  %v3619_v0 = vld [vmem:[#allocation2 + $0x104] ss:$16 sps:$4 sm:$0xff]   ;;  %v3623_v2 = vld [vmem:[#allocation2 + $0x100] ss:$16 sps:$4 sm:$0xff]  }
  0x3b   :  { %1492 = vmatpush1.bf16.msra.mxu1 %v3576_v31  ;;  %1452 = vmatprep.subr.bf16.mxu0 %v3577_v32  ;;  %v3621_v1 = vld [vmem:[#allocation2 + $0x304] ss:$16 sps:$4 sm:$0xff]   ;;  %v3624_v3 = vld [vmem:[#allocation2 + $0x300] ss:$16 sps:$4 sm:$0xff]  }
  0x3c   :  { %1493 = vmatprep.subr.bf16.mxu1 %v3579_v33  ;;  %v56_v4 = vld [vmem:[%s4414_s0] sm:$0xff]  ;;  %v58_v5 = vld [vmem:[%s4414_s0 + $0x10] sm:$0xff] }
  0x3d   :  { %v3627_v6 = vld [vmem:[#allocation2 + $0x4e4] ss:$16 sps:$4 sm:$0xff]   ;;  %v4225_v8 = vpack.c.bf16 %v56_v4, %v56_v4  ;;  %v4227_v9 = vpack.c.bf16 %v58_v5, %v58_v5  ;;  %v3625_v10 = vld [vmem:[#allocation2 + $0x4e0] ss:$16 sps:$4 sm:$0xff]   ;;  %v3706_v5 = vld [vmem:[#allocation2 + $0x48] ss:$16 sps:$4 sm:$0xff]  }
  0x3e   :  { %1453 = vmatpush2.bf16.msra.mxu0 %v3581_v34  ;;  %v3630_v7 = vld [vmem:[#allocation2 + $0x6e4] ss:$16 sps:$4 sm:$0xff]   ;;  %v3628_v11 = vld [vmem:[#allocation2 + $0x6e0] ss:$16 sps:$4 sm:$0xff]  }
  0x3f   :  { %1494 = vmatpush2.bf16.msra.mxu1 %v3582_v35  ;;  %1454 = vmatprep.subr.bf16.mxu0 %v3583_v36  ;;  %v3633_v12 = vld [vmem:[#allocation2 + $0x4c4] ss:$16 sps:$4 sm:$0xff]   ;;  %v3631_v14 = vld [vmem:[#allocation2 + $0x4c0] ss:$16 sps:$4 sm:$0xff]   ;;  %v61_v36 = vld [vmem:[%s4414_s0 + $0x28] sm:$0xff] }
  0x40   :  { %1495 = vmatprep.subr.bf16.mxu1 %v3585_v37  ;;  %v3636_v13 = vld [vmem:[#allocation2 + $0x6c4] ss:$16 sps:$4 sm:$0xff]   ;;  %v3634_v15 = vld [vmem:[#allocation2 + $0x6c0] ss:$16 sps:$4 sm:$0xff]  }
  0x41   :  { %v3639_v16 = vld [vmem:[#allocation2 + $0x4a4] ss:$16 sps:$4 sm:$0xff]   ;;  %v3637_v19 = vld [vmem:[#allocation2 + $0x4a0] ss:$16 sps:$4 sm:$0xff]  }
  0x42   :  { %1455 = vmatpush2.bf16.msra.mxu0 %v3587_v38  ;;  %v3642_v17 = vld [vmem:[#allocation2 + $0x6a4] ss:$16 sps:$4 sm:$0xff]   ;;  %v3640_v20 = vld [vmem:[#allocation2 + $0x6a0] ss:$16 sps:$4 sm:$0xff]  }
  0x43   :  { %1496 = vmatpush2.bf16.msra.mxu1 %v3588_v39  ;;  %1456 = vmatprep.subr.bf16.mxu0 %v3589_v40  ;;  %v3645_v21 = vld [vmem:[#allocation2 + $0x484] ss:$16 sps:$4 sm:$0xff]   ;;  %v3643_v23 = vld [vmem:[#allocation2 + $0x480] ss:$16 sps:$4 sm:$0xff]   ;;  %v4235_v39 = vpack.c.bf16 %v61_v36, %v61_v36  ;;  %v3750_v36 = vld [vmem:[#allocation2 + $0x26c] ss:$16 sps:$4 sm:$0xff]  }
  0x44   :  { %1497 = vmatprep.subr.bf16.mxu1 %v3591_v41  ;;  %v3648_v22 = vld [vmem:[#allocation2 + $0x684] ss:$16 sps:$4 sm:$0xff]   ;;  %v3646_v24 = vld [vmem:[#allocation2 + $0x680] ss:$16 sps:$4 sm:$0xff]  }
  0x45   :  { %v3651_v25 = vld [vmem:[#allocation2 + $0x464] ss:$16 sps:$4 sm:$0xff]   ;;  %v3649_v27 = vld [vmem:[#allocation2 + $0x460] ss:$16 sps:$4 sm:$0xff]  }
  0x46   :  { %1457 = vmatpush2.bf16.msra.mxu0 %v3593_v42  ;;  %v3654_v26 = vld [vmem:[#allocation2 + $0x664] ss:$16 sps:$4 sm:$0xff]   ;;  %v3652_v28 = vld [vmem:[#allocation2 + $0x660] ss:$16 sps:$4 sm:$0xff]  }
  0x47   :  { %1498 = vmatpush2.bf16.msra.mxu1 %v3594_v43  ;;  %1458 = vmatprep.subr.bf16.mxu0 %v3595_v44  ;;  %v3657_v29 = vld [vmem:[#allocation2 + $0x444] ss:$16 sps:$4 sm:$0xff]   ;;  %v3655_v31 = vld [vmem:[#allocation2 + $0x440] ss:$16 sps:$4 sm:$0xff]  }
  0x48   :  { %1499 = vmatprep.subr.bf16.mxu1 %v3597_v45  ;;  %v3660_v30 = vld [vmem:[#allocation2 + $0x644] ss:$16 sps:$4 sm:$0xff]   ;;  %v3658_v32 = vld [vmem:[#allocation2 + $0x640] ss:$16 sps:$4 sm:$0xff]   ;;  %v3678_v45 = vld [vmem:[#allocation2 + $0xec] ss:$16 sps:$4 sm:$0xff]  }
  0x49   :  { %v3663_v33 = vld [vmem:[#allocation2 + $0x424] ss:$16 sps:$4 sm:$0xff]   ;;  %v3661_v35 = vld [vmem:[#allocation2 + $0x420] ss:$16 sps:$4 sm:$0xff]  }
  0x4a   :  { %1459 = vmatpush2.bf16.msra.mxu0 %v3599_v47  ;;  %v3666_v34 = vld [vmem:[#allocation2 + $0x624] ss:$16 sps:$4 sm:$0xff]   ;;  %v3664_v37 = vld [vmem:[#allocation2 + $0x620] ss:$16 sps:$4 sm:$0xff]  }
  0x4b   :  { %1500 = vmatpush2.bf16.msra.mxu1 %v3600_v48  ;;  %1460 = vmatprep.subr.bf16.mxu0 %v3601_v51  ;;  %v3669_v38 = vld [vmem:[#allocation2 + $0x404] ss:$16 sps:$4 sm:$0xff]   ;;  %v3667_v41 = vld [vmem:[#allocation2 + $0x400] ss:$16 sps:$4 sm:$0xff]   ;;  %v3676_v48 = vld [vmem:[#allocation2 + $0xe8] ss:$16 sps:$4 sm:$0xff]  }
  0x4c   :  { %1501 = vmatprep.subr.bf16.mxu1 %v3603_v53  ;;  %v3672_v40 = vld [vmem:[#allocation2 + $0x604] ss:$16 sps:$4 sm:$0xff]   ;;  %v3670_v42 = vld [vmem:[#allocation2 + $0x600] ss:$16 sps:$4 sm:$0xff]   ;;  %v3684_v51 = vld [vmem:[#allocation2 + $0xcc] ss:$16 sps:$4 sm:$0xff]  }
  0x4d   :  { %v3675_v43 = vld [vmem:[#allocation2 + $0x5e4] ss:$16 sps:$4 sm:$0xff]   ;;  %v3673_v46 = vld [vmem:[#allocation2 + $0x5e0] ss:$16 sps:$4 sm:$0xff]  }
  0x4e   :  { %1461 = vmatpush2.bf16.msra.mxu0 %v3605_v54  ;;  %v62_v44 = vld [vmem:[%s4414_s0 + $0x30] sm:$0xff]  ;;  %v3682_v54 = vld [vmem:[#allocation2 + $0xc8] ss:$16 sps:$4 sm:$0xff]  }
  0x4f   :  { %1502 = vmatpush2.bf16.msra.mxu1 %v3606_v55  ;;  %1462 = vmatprep.subr.bf16.mxu0 %v3607_v56  ;;  %v4241_v47 = vpack.c.bf16 %v62_v44, %v62_v44  ;;  %v3681_v50 = vld [vmem:[#allocation2 + $0x5c4] ss:$16 sps:$4 sm:$0xff]   ;;  %v3679_v53 = vld [vmem:[#allocation2 + $0x5c0] ss:$16 sps:$4 sm:$0xff]   ;;  %v3690_v56 = vld [vmem:[#allocation2 + $0xac] ss:$16 sps:$4 sm:$0xff]  }
  0x50   :  { %1503 = vmatprep.subr.bf16.mxu1 %v3609_v57  ;;  %v3687_v55 = vld [vmem:[#allocation2 + $0x5a4] ss:$16 sps:$4 sm:$0xff]   ;;  %v3685_v57 = vld [vmem:[#allocation2 + $0x5a0] ss:$16 sps:$4 sm:$0xff]   ;;  %v3762_v44 = vld [vmem:[#allocation2 + $0x22c] ss:$16 sps:$4 sm:$0xff]  }
  0x51   :  { %v3703_v4 = vld [vmem:[#allocation2 + $0x540] ss:$16 sps:$4 sm:$0xff]  }
  0x52   :  { %1463 = vmatpush2.bf16.msra.mxu0 %v3611_v58  ;;  %v3688_v58 = vld [vmem:[#allocation2 + $0xa8] ss:$16 sps:$4 sm:$0xff]  }
  0x53   :  { %1504 = vmatpush2.bf16.msra.mxu1 %v3612_v59  ;;  %1464 = vmatprep.subr.bf16.mxu0 %v3613_v60  ;;  %v3693_v59 = vld [vmem:[#allocation2 + $0x584] ss:$16 sps:$4 sm:$0xff]   ;;  %v3696_v60 = vld [vmem:[#allocation2 + $0x8c] ss:$16 sps:$4 sm:$0xff]  }
  0x54   :  { %1505 = vmatprep.subr.bf16.mxu1 %v3615_v61  ;;  %v3691_v61 = vld [vmem:[#allocation2 + $0x580] ss:$16 sps:$4 sm:$0xff]  }
  0x56   :  { %1465 = vmatpush2.bf16.msra.mxu0 %v3617_v62  ;;  %v3694_v62 = vld [vmem:[#allocation2 + $0x88] ss:$16 sps:$4 sm:$0xff]  }
  0x57   :  { %1506 = vmatpush2.bf16.msra.mxu1 %v3618_v63  ;;  %1466 = vmatprep.subr.bf16.mxu0 %v3619_v0  ;;  %v3699_v63 = vld [vmem:[#allocation2 + $0x564] ss:$16 sps:$4 sm:$0xff]   ;;  %v3702_v0 = vld [vmem:[#allocation2 + $0x6c] ss:$16 sps:$4 sm:$0xff]  }
  0x58   :  { %1507 = vmatprep.subr.bf16.mxu1 %v3621_v1  ;;  %v3697_v1 = vld [vmem:[#allocation2 + $0x560] ss:$16 sps:$4 sm:$0xff]  }
  0x5a   :  { %1467 = vmatpush2.bf16.msra.mxu0 %v3623_v2  ;;  %v3705_v2 = vld [vmem:[#allocation2 + $0x544] ss:$16 sps:$4 sm:$0xff]  }
  0x5b   :  { %1508 = vmatpush2.bf16.msra.mxu1 %v3624_v3  ;;  %1518 = vmatprep.subr.bf16.mxu0 %v3627_v6  ;;  %v3708_v3 = vld [vmem:[#allocation2 + $0x4c] ss:$16 sps:$4 sm:$0xff]   ;;  %v3711_v6 = vld [vmem:[#allocation2 + $0x524] ss:$16 sps:$4 sm:$0xff]  }
  0x5c   :  { %1559 = vmatprep.subr.bf16.mxu1 %v3630_v7  ;;  %v3714_v7 = vld [vmem:[#allocation2 + $0x2c] ss:$16 sps:$4 sm:$0xff]  }
  0x5d   :  { %1469 = vmatmul.mubr.bf16.vlgmr.msra.gmra.mxu0 %v4225_v8 }
  0x5e   :  { %1510 = vmatmul.mubr.bf16.vlgmr.msra.gmra.mxu1 %v4227_v9  ;;  %1519 = vmatpush1.bf16.msra.mxu0 %v3625_v10  ;;  %v3709_v10 = vld [vmem:[#allocation2 + $0x520] ss:$16 sps:$4 sm:$0xff]  }
  0x5f   :  { %1560 = vmatpush1.bf16.msra.mxu1 %v3628_v11  ;;  %1520 = vmatprep.subr.bf16.mxu0 %v3633_v12  ;;  %v3712_v11 = vld [vmem:[#allocation2 + $0x28] ss:$16 sps:$4 sm:$0xff]   ;;  %v3717_v12 = vld [vmem:[#allocation2 + $0x504] ss:$16 sps:$4 sm:$0xff]  }
  0x60   :  { %1561 = vmatprep.subr.bf16.mxu1 %v3636_v13  ;;  %1591 = vmatprep.mubr.bf16.mxu1 %v4159_v18  ;;  %v3720_v13 = vld [vmem:[#allocation2 + $0xc] ss:$16 sps:$4 sm:$0xff]  }
  0x61   :  { %1550 = vmatprep.mubr.bf16.mxu0 %v4235_v39 }
  0x62   :  { %1521 = vmatpush1.bf16.msra.mxu0 %v3631_v14  ;;  %v3715_v14 = vld [vmem:[#allocation2 + $0x500] ss:$16 sps:$4 sm:$0xff]  }
  0x63   :  { %1562 = vmatpush1.bf16.msra.mxu1 %v3634_v15  ;;  %1522 = vmatprep.subr.bf16.mxu0 %v3639_v16  ;;  %v3718_v15 = vld [vmem:[#allocation2 + $0x8] ss:$16 sps:$4 sm:$0xff]   ;;  %v60_v16 = vld [vmem:[%s4414_s0 + $0x20] sm:$0xff] }
  0x64   :  { %1563 = vmatprep.subr.bf16.mxu1 %v3642_v17  ;;  %v3723_v17 = vld [vmem:[#allocation2 + $0x1ec] ss:$16 sps:$4 sm:$0xff]  }
  0x66   :  { %1523 = vmatpush1.bf16.msra.mxu0 %v3637_v19  ;;  %v3726_v19 = vld [vmem:[#allocation2 + $0x2ec] ss:$16 sps:$4 sm:$0xff]  }
  0x67   :  { %1564 = vmatpush1.bf16.msra.mxu1 %v3640_v20  ;;  %1524 = vmatprep.subr.bf16.mxu0 %v3645_v21  ;;  %v4248_v20 = vpack.c.bf16 %v60_v16, %v60_v16  ;;  %v3721_v21 = vld [vmem:[#allocation2 + $0x1e8] ss:$16 sps:$4 sm:$0xff]  }
  0x68   :  { %1565 = vmatprep.subr.bf16.mxu1 %v3648_v22  ;;  %v3724_v22 = vld [vmem:[#allocation2 + $0x2e8] ss:$16 sps:$4 sm:$0xff]  }
  0x69   :  { %v3808_v16 = vld [vmem:[#allocation2 + $0x428] ss:$16 sps:$4 sm:$0xff]  }
  0x6a   :  { %1525 = vmatpush1.bf16.msra.mxu0 %v3643_v23  ;;  %v3729_v23 = vld [vmem:[#allocation2 + $0x1cc] ss:$16 sps:$4 sm:$0xff]  }
  0x6b   :  { %1566 = vmatpush1.bf16.msra.mxu1 %v3646_v24  ;;  %1526 = vmatprep.subr.bf16.mxu0 %v3651_v25  ;;  %v3732_v24 = vld [vmem:[#allocation2 + $0x2cc] ss:$16 sps:$4 sm:$0xff]   ;;  %v3727_v25 = vld [vmem:[#allocation2 + $0x1c8] ss:$16 sps:$4 sm:$0xff]  }
  0x6c   :  { %1567 = vmatprep.subr.bf16.mxu1 %v3654_v26  ;;  %v3730_v26 = vld [vmem:[#allocation2 + $0x2c8] ss:$16 sps:$4 sm:$0xff]  }
  0x6e   :  { %1527 = vmatpush1.bf16.msra.mxu0 %v3649_v27  ;;  %v3735_v27 = vld [vmem:[#allocation2 + $0x1ac] ss:$16 sps:$4 sm:$0xff]  }
  0x6f   :  { %1568 = vmatpush1.bf16.msra.mxu1 %v3652_v28  ;;  %1528 = vmatprep.subr.bf16.mxu0 %v3657_v29  ;;  %v3738_v28 = vld [vmem:[#allocation2 + $0x2ac] ss:$16 sps:$4 sm:$0xff]   ;;  %v3733_v29 = vld [vmem:[#allocation2 + $0x1a8] ss:$16 sps:$4 sm:$0xff]  }
  0x70   :  { %1569 = vmatprep.subr.bf16.mxu1 %v3660_v30  ;;  %v3736_v30 = vld [vmem:[#allocation2 + $0x2a8] ss:$16 sps:$4 sm:$0xff]  }
  0x72   :  { %1529 = vmatpush1.bf16.msra.mxu0 %v3655_v31  ;;  %v3741_v31 = vld [vmem:[#allocation2 + $0x18c] ss:$16 sps:$4 sm:$0xff]  }
  0x73   :  { %1570 = vmatpush1.bf16.msra.mxu1 %v3658_v32  ;;  %1530 = vmatprep.subr.bf16.mxu0 %v3663_v33  ;;  %v3744_v32 = vld [vmem:[#allocation2 + $0x28c] ss:$16 sps:$4 sm:$0xff]   ;;  %v3739_v33 = vld [vmem:[#allocation2 + $0x188] ss:$16 sps:$4 sm:$0xff]  }
  0x74   :  { %1571 = vmatprep.subr.bf16.mxu1 %v3666_v34  ;;  %v3742_v34 = vld [vmem:[#allocation2 + $0x288] ss:$16 sps:$4 sm:$0xff]  }
  0x76   :  { %1531 = vmatpush1.bf16.msra.mxu0 %v3661_v35  ;;  %v3747_v35 = vld [vmem:[#allocation2 + $0x16c] ss:$16 sps:$4 sm:$0xff]  }
  0x77   :  { %1572 = vmatpush1.bf16.msra.mxu1 %v3664_v37  ;;  %1532 = vmatprep.subr.bf16.mxu0 %v3669_v38  ;;  %v3745_v37 = vld [vmem:[#allocation2 + $0x168] ss:$16 sps:$4 sm:$0xff]   ;;  %v3753_v38 = vld [vmem:[#allocation2 + $0x14c] ss:$16 sps:$4 sm:$0xff]  }
  0x78   :  { %1573 = vmatprep.subr.bf16.mxu1 %v3672_v40  ;;  %v3756_v40 = vld [vmem:[#allocation2 + $0x24c] ss:$16 sps:$4 sm:$0xff]  }
  0x7a   :  { %1533 = vmatpush1.bf16.msra.mxu0 %v3667_v41  ;;  %v3751_v41 = vld [vmem:[#allocation2 + $0x148] ss:$16 sps:$4 sm:$0xff]  }
  0x7b   :  { %1574 = vmatpush1.bf16.msra.mxu1 %v3670_v42  ;;  %1534 = vmatprep.subr.bf16.mxu0 %v3675_v43  ;;  %v3754_v42 = vld [vmem:[#allocation2 + $0x248] ss:$16 sps:$4 sm:$0xff]   ;;  %v3759_v43 = vld [vmem:[#allocation2 + $0x12c] ss:$16 sps:$4 sm:$0xff]  }
  0x7c   :  { %1600 = vmatprep.subr.bf16.mxu1 %v3678_v45  ;;  %v3757_v45 = vld [vmem:[#allocation2 + $0x128] ss:$16 sps:$4 sm:$0xff]  }
  0x7e   :  { %1592 = vmatmul.mubr.bf16.vlgmr.msra.gmra.mxu1 %v4241_v47  ;;  %1535 = vmatpush2.bf16.msra.mxu0 %v3673_v46  ;;  %v3760_v46 = vld [vmem:[#allocation2 + $0x228] ss:$16 sps:$4 sm:$0xff]  }
  0x7f   :  { %1601 = vmatpush1.bf16.msra.mxu1 %v3676_v48  ;;  %1536 = vmatprep.subr.bf16.mxu0 %v3681_v50  ;;  %v3765_v48 = vld [vmem:[#allocation2 + $0x10c] ss:$16 sps:$4 sm:$0xff]  }
  0x80   :  { %1602 = vmatprep.subr.bf16.mxu1 %v3684_v51  ;;  %1632 = vmatprep.mubr.bf16.mxu1 %v4210_v49  ;;  %v3700_v49 = vld [vmem:[#allocation2 + $0x68] ss:$16 sps:$4 sm:$0xff]   ;;  %v3768_v50 = vld [vmem:[#allocation2 + $0x20c] ss:$16 sps:$4 sm:$0xff]  }
  0x81   :  { %v3763_v51 = vld [vmem:[#allocation2 + $0x108] ss:$16 sps:$4 sm:$0xff]  }
  0x82   :  { %1537 = vmatpush2.bf16.msra.mxu0 %v3679_v53  ;;  %v3766_v53 = vld [vmem:[#allocation2 + $0x208] ss:$16 sps:$4 sm:$0xff]  }
  0x83   :  { %1603 = vmatpush1.bf16.msra.mxu1 %v3682_v54  ;;  %1538 = vmatprep.subr.bf16.mxu0 %v3687_v55  ;;  %v3771_v54 = vld [vmem:[#allocation2 + $0x3ec] ss:$16 sps:$4 sm:$0xff]  }
  0x84   :  { %1604 = vmatprep.subr.bf16.mxu1 %v3690_v56  ;;  %v3774_v55 = vld [vmem:[#allocation2 + $0x4ec] ss:$16 sps:$4 sm:$0xff]   ;;  %v3769_v56 = vld [vmem:[#allocation2 + $0x3e8] ss:$16 sps:$4 sm:$0xff]  }
  0x86   :  { %1539 = vmatpush2.bf16.msra.mxu0 %v3685_v57  ;;  %v3772_v57 = vld [vmem:[#allocation2 + $0x4e8] ss:$16 sps:$4 sm:$0xff]  }
  0x87   :  { %1605 = vmatpush1.bf16.msra.mxu1 %v3688_v58  ;;  %1540 = vmatprep.subr.bf16.mxu0 %v3693_v59  ;;  %v3777_v58 = vld [vmem:[#allocation2 + $0x3cc] ss:$16 sps:$4 sm:$0xff]  }
  0x88   :  { %1606 = vmatprep.subr.bf16.mxu1 %v3696_v60  ;;  %v3780_v59 = vld [vmem:[#allocation2 + $0x4cc] ss:$16 sps:$4 sm:$0xff]   ;;  %v3775_v60 = vld [vmem:[#allocation2 + $0x3c8] ss:$16 sps:$4 sm:$0xff]  }
  0x8a   :  { %1541 = vmatpush2.bf16.msra.mxu0 %v3691_v61  ;;  %v3778_v61 = vld [vmem:[#allocation2 + $0x4c8] ss:$16 sps:$4 sm:$0xff]  }
  0x8b   :  { %1607 = vmatpush1.bf16.msra.mxu1 %v3694_v62  ;;  %1542 = vmatprep.subr.bf16.mxu0 %v3699_v63  ;;  %v3783_v62 = vld [vmem:[#allocation2 + $0x3ac] ss:$16 sps:$4 sm:$0xff]  }
  0x8c   :  { %1608 = vmatprep.subr.bf16.mxu1 %v3702_v0  ;;  %v3786_v63 = vld [vmem:[#allocation2 + $0x4ac] ss:$16 sps:$4 sm:$0xff]   ;;  %v3781_v0 = vld [vmem:[#allocation2 + $0x3a8] ss:$16 sps:$4 sm:$0xff]  }
  0x8e   :  { %1543 = vmatpush2.bf16.msra.mxu0 %v3697_v1  ;;  %v3784_v1 = vld [vmem:[#allocation2 + $0x4a8] ss:$16 sps:$4 sm:$0xff]  }
  0x8f   :  { %1609 = vmatpush1.bf16.msra.mxu1 %v3700_v49  ;;  %1544 = vmatprep.subr.bf16.mxu0 %v3705_v2  ;;  %v3789_v49 = vld [vmem:[#allocation2 + $0x38c] ss:$16 sps:$4 sm:$0xff]  }
  0x90   :  { %1610 = vmatprep.subr.bf16.mxu1 %v3708_v3  ;;  %v3792_v2 = vld [vmem:[#allocation2 + $0x48c] ss:$16 sps:$4 sm:$0xff]   ;;  %v3787_v3 = vld [vmem:[#allocation2 + $0x388] ss:$16 sps:$4 sm:$0xff]  }
  0x92   :  { %1545 = vmatpush2.bf16.msra.mxu0 %v3703_v4  ;;  %v3795_v4 = vld [vmem:[#allocation2 + $0x36c] ss:$16 sps:$4 sm:$0xff]  }
  0x93   :  { %1611 = vmatpush1.bf16.msra.mxu1 %v3706_v5  ;;  %1546 = vmatprep.subr.bf16.mxu0 %v3711_v6  ;;  %v3798_v5 = vld [vmem:[#allocation2 + $0x46c] ss:$16 sps:$4 sm:$0xff]   ;;  %v3793_v6 = vld [vmem:[#allocation2 + $0x368] ss:$16 sps:$4 sm:$0xff]  }
  0x94   :  { %1612 = vmatprep.subr.bf16.mxu1 %v3714_v7  ;;  %v3796_v7 = vld [vmem:[#allocation2 + $0x468] ss:$16 sps:$4 sm:$0xff]  }
  0x96   :  { %1547 = vmatpush2.bf16.msra.mxu0 %v3709_v10  ;;  %v3801_v10 = vld [vmem:[#allocation2 + $0x34c] ss:$16 sps:$4 sm:$0xff]  }
  0x97   :  { %1613 = vmatpush1.bf16.msra.mxu1 %v3712_v11  ;;  %1548 = vmatprep.subr.bf16.mxu0 %v3717_v12  ;;  %v3804_v11 = vld [vmem:[#allocation2 + $0x44c] ss:$16 sps:$4 sm:$0xff]   ;;  %v3802_v12 = vld [vmem:[#allocation2 + $0x448] ss:$16 sps:$4 sm:$0xff]  }
  0x98   :  { %1614 = vmatprep.subr.bf16.mxu1 %v3720_v13  ;;  %v3807_v13 = vld [vmem:[#allocation2 + $0x32c] ss:$16 sps:$4 sm:$0xff]  }
  0x9a   :  { %1549 = vmatpush2.bf16.msra.mxu0 %v3715_v14  ;;  %v3810_v14 = vld [vmem:[#allocation2 + $0x42c] ss:$16 sps:$4 sm:$0xff]  }
  0x9b   :  { %1615 = vmatpush1.bf16.msra.mxu1 %v3718_v15  ;;  %1641 = vmatprep.subr.bf16.mxu0 %v3726_v19  ;;  %v3805_v15 = vld [vmem:[#allocation2 + $0x328] ss:$16 sps:$4 sm:$0xff]   ;;  %v3816_v19 = vld [vmem:[#allocation2 + $0x40c] ss:$16 sps:$4 sm:$0xff]  }
  0x9c   :  { %1616 = vmatprep.subr.bf16.mxu1 %v3723_v17  ;;  %v3813_v17 = vld [vmem:[#allocation2 + $0x30c] ss:$16 sps:$4 sm:$0xff]  }
  0x9d   :  { %1551 = vmatmul.mubr.bf16.vlgmr.msra.gmra.mxu0 %v4248_v20 }
  0x9e   :  { %1642 = vmatpush1.bf16.msra.mxu0 %v3724_v22  ;;  %1673 = vmatprep.mubr.bf16.mxu0 %v4215_v52  ;;  %v3748_v52 = vld [vmem:[#allocation2 + $0x268] ss:$16 sps:$4 sm:$0xff]  }
  0x9f   :  { %1617 = vmatpush2.bf16.msra.mxu1 %v3721_v21  ;;  %1643 = vmatprep.subr.bf16.mxu0 %v3732_v24  ;;  %v3811_v21 = vld [vmem:[#allocation2 + $0x308] ss:$16 sps:$4 sm:$0xff]   ;;  %v3822_v24 = vld [vmem:[#allocation2 + $0x6ec] ss:$16 sps:$4 sm:$0xff]  }
  0xa0   :  { %1618 = vmatprep.subr.bf16.mxu1 %v3729_v23  ;;  %v3814_v22 = vld [vmem:[#allocation2 + $0x408] ss:$16 sps:$4 sm:$0xff]   ;;  %v3819_v23 = vld [vmem:[#allocation2 + $0x5ec] ss:$16 sps:$4 sm:$0xff]  }
  0xa2   :  { %1644 = vmatpush1.bf16.msra.mxu0 %v3730_v26  ;;  %v3820_v26 = vld [vmem:[#allocation2 + $0x6e8] ss:$16 sps:$4 sm:$0xff]  }
  0xa3   :  { %1619 = vmatpush2.bf16.msra.mxu1 %v3727_v25  ;;  %1645 = vmatprep.subr.bf16.mxu0 %v3738_v28  ;;  %v3817_v25 = vld [vmem:[#allocation2 + $0x5e8] ss:$16 sps:$4 sm:$0xff]   ;;  %v3828_v28 = vld [vmem:[#allocation2 + $0x6cc] ss:$16 sps:$4 sm:$0xff]  }
  0xa4   :  { %1620 = vmatprep.subr.bf16.mxu1 %v3735_v27  ;;  %v3825_v27 = vld [vmem:[#allocation2 + $0x5cc] ss:$16 sps:$4 sm:$0xff]  }
  0xa6   :  { %1646 = vmatpush1.bf16.msra.mxu0 %v3736_v30  ;;  %v3826_v30 = vld [vmem:[#allocation2 + $0x6c8] ss:$16 sps:$4 sm:$0xff]  }
  0xa7   :  { %1621 = vmatpush2.bf16.msra.mxu1 %v3733_v29  ;;  %1647 = vmatprep.subr.bf16.mxu0 %v3744_v32  ;;  %v3823_v29 = vld [vmem:[#allocation2 + $0x5c8] ss:$16 sps:$4 sm:$0xff]   ;;  %v3834_v32 = vld [vmem:[#allocation2 + $0x6ac] ss:$16 sps:$4 sm:$0xff]  }
  0xa8   :  { %1622 = vmatprep.subr.bf16.mxu1 %v3741_v31  ;;  %v3831_v31 = vld [vmem:[#allocation2 + $0x5ac] ss:$16 sps:$4 sm:$0xff]  }
  0xaa   :  { %1648 = vmatpush1.bf16.msra.mxu0 %v3742_v34  ;;  %v3832_v34 = vld [vmem:[#allocation2 + $0x6a8] ss:$16 sps:$4 sm:$0xff]  }
  0xab   :  { %1623 = vmatpush2.bf16.msra.mxu1 %v3739_v33  ;;  %1649 = vmatprep.subr.bf16.mxu0 %v3750_v36  ;;  %v3829_v33 = vld [vmem:[#allocation2 + $0x5a8] ss:$16 sps:$4 sm:$0xff]   ;;  %v3840_v36 = vld [vmem:[#allocation2 + $0x68c] ss:$16 sps:$4 sm:$0xff]  }
  0xac   :  { %1624 = vmatprep.subr.bf16.mxu1 %v3747_v35  ;;  %v3837_v35 = vld [vmem:[#allocation2 + $0x58c] ss:$16 sps:$4 sm:$0xff]  }
  0xae   :  { %1650 = vmatpush1.bf16.msra.mxu0 %v3748_v52  ;;  %v3838_v52 = vld [vmem:[#allocation2 + $0x688] ss:$16 sps:$4 sm:$0xff]  }
  0xaf   :  { %1625 = vmatpush2.bf16.msra.mxu1 %v3745_v37  ;;  %1651 = vmatprep.subr.bf16.mxu0 %v3756_v40  ;;  %v3835_v37 = vld [vmem:[#allocation2 + $0x588] ss:$16 sps:$4 sm:$0xff]  }
  0xb0   :  { %1626 = vmatprep.subr.bf16.mxu1 %v3753_v38  ;;  %v3846_v38 = vld [vmem:[#allocation2 + $0x66c] ss:$16 sps:$4 sm:$0xff]   ;;  %v3841_v40 = vld [vmem:[#allocation2 + $0x568] ss:$16 sps:$4 sm:$0xff]  }
  0xb2   :  { %1652 = vmatpush1.bf16.msra.mxu0 %v3754_v42  ;;  %v3849_v42 = vld [vmem:[#allocation2 + $0x54c] ss:$16 sps:$4 sm:$0xff]  }
  0xb3   :  { %1627 = vmatpush2.bf16.msra.mxu1 %v3751_v41  ;;  %1653 = vmatprep.subr.bf16.mxu0 %v3762_v44  ;;  %v3844_v41 = vld [vmem:[#allocation2 + $0x668] ss:$16 sps:$4 sm:$0xff]  }
  0xb4   :  { %1628 = vmatprep.subr.bf16.mxu1 %v3759_v43  ;;  %v3847_v43 = vld [vmem:[#allocation2 + $0x548] ss:$16 sps:$4 sm:$0xff]  }
  0xb5   :  { %v3850_v44 = vld [vmem:[#allocation2 + $0x648] ss:$16 sps:$4 sm:$0xff]  }
  0xb6   :  { %1654 = vmatpush1.bf16.msra.mxu0 %v3760_v46  ;;  %v3858_v46 = vld [vmem:[#allocation2 + $0x62c] ss:$16 sps:$4 sm:$0xff]  }
  0xb7   :  { %1629 = vmatpush2.bf16.msra.mxu1 %v3757_v45  ;;  %1655 = vmatprep.subr.bf16.mxu0 %v3768_v50  ;;  %v3855_v45 = vld [vmem:[#allocation2 + $0x52c] ss:$16 sps:$4 sm:$0xff]   ;;  %v3856_v50 = vld [vmem:[#allocation2 + $0x628] ss:$16 sps:$4 sm:$0xff]  }
  0xb8   :  { %1630 = vmatprep.subr.bf16.mxu1 %v3765_v48  ;;  %v3853_v48 = vld [vmem:[#allocation2 + $0x528] ss:$16 sps:$4 sm:$0xff]  }
  0xba   :  { %1656 = vmatpush1.bf16.msra.mxu0 %v3766_v53  ;;  %v3864_v53 = vld [vmem:[#allocation2 + $0x60c] ss:$16 sps:$4 sm:$0xff]  }
  0xbb   :  { %1631 = vmatpush2.bf16.msra.mxu1 %v3763_v51  ;;  %1657 = vmatprep.subr.bf16.mxu0 %v3771_v54  ;;  %v3861_v51 = vld [vmem:[#allocation2 + $0x50c] ss:$16 sps:$4 sm:$0xff]   ;;  %v3859_v54 = vld [vmem:[#allocation2 + $0x508] ss:$16 sps:$4 sm:$0xff]  }
  0xbc   :  { %1682 = vmatprep.subr.bf16.mxu1 %v3774_v55  ;;  %v3862_v55 = vld [vmem:[#allocation2 + $0x608] ss:$16 sps:$4 sm:$0xff]  }
  0xbe   :  { %1633 = vmatmul.mubr.bf16.vlgmr.msra.gmra.mxu1 %v4225_v8  ;;  %1658 = vmatpush2.bf16.msra.mxu0 %v3769_v56  ;;  %v3790_v8 = vld [vmem:[#allocation2 + $0x488] ss:$16 sps:$4 sm:$0xff]   ;;  %v3867_v56 = vld [vmem:[#allocation5 + $0xe4] ss:$16 sps:$4 sm:$0xff]  }
  0xbf   :  { %1683 = vmatpush1.bf16.msra.mxu1 %v3772_v57  ;;  %1659 = vmatprep.subr.bf16.mxu0 %v3777_v58  ;;  %v3865_v57 = vld [vmem:[#allocation5 + $0xe0] ss:$16 sps:$4 sm:$0xff]   ;;  %v3870_v58 = vld [vmem:[#allocation5 + $0xc4] ss:$16 sps:$4 sm:$0xff]  }
  0xc0   :  { %1684 = vmatprep.subr.bf16.mxu1 %v3780_v59  ;;  %1714 = vmatprep.mubr.bf16.mxu1 %v4235_v39  ;;  %v3799_v39 = vld [vmem:[#allocation2 + $0x348] ss:$16 sps:$4 sm:$0xff]   ;;  %v3868_v59 = vld [vmem:[#allocation5 + $0xc0] ss:$16 sps:$4 sm:$0xff]  }
  0xc2   :  { %1660 = vmatpush2.bf16.msra.mxu0 %v3775_v60  ;;  %v3873_v60 = vld [vmem:[#allocation5 + $0xa4] ss:$16 sps:$4 sm:$0xff]  }
  0xc3   :  { %1685 = vmatpush1.bf16.msra.mxu1 %v3778_v61  ;;  %1661 = vmatprep.subr.bf16.mxu0 %v3783_v62  ;;  %v3871_v61 = vld [vmem:[#allocation5 + $0xa0] ss:$16 sps:$4 sm:$0xff]   ;;  %v3876_v62 = vld [vmem:[#allocation5 + $0x84] ss:$16 sps:$4 sm:$0xff]  }
  0xc4   :  { %1686 = vmatprep.subr.bf16.mxu1 %v3786_v63  ;;  %v3874_v63 = vld [vmem:[#allocation5 + $0x80] ss:$16 sps:$4 sm:$0xff]  }
  0xc6   :  { %1662 = vmatpush2.bf16.msra.mxu0 %v3781_v0  ;;  %v3937_v0 = vld [vmem:[#allocation5 + $0x2e0] ss:$16 sps:$4 sm:$0xff]  }
  0xc7   :  { %1687 = vmatpush1.bf16.msra.mxu1 %v3784_v1  ;;  %1663 = vmatprep.subr.bf16.mxu0 %v3789_v49  ;;  %v3939_v1 = vld [vmem:[#allocation5 + $0x2e4] ss:$16 sps:$4 sm:$0xff]  }
  0xc8   :  { %1688 = vmatprep.subr.bf16.mxu1 %v3792_v2  ;;  %v3879_v49 = vld [vmem:[#allocation5 + $0x64] ss:$16 sps:$4 sm:$0xff]   ;;  %v3943_v2 = vld [vmem:[#allocation5 + $0x2c0] ss:$16 sps:$4 sm:$0xff]  }
  0xca   :  { %1664 = vmatpush2.bf16.msra.mxu0 %v3787_v3  ;;  %v3882_v3 = vld [vmem:[#allocation5 + $0x44] ss:$16 sps:$4 sm:$0xff]  }
  0xcb   :  { %1689 = vmatpush1.bf16.msra.mxu1 %v3790_v8  ;;  %1665 = vmatprep.subr.bf16.mxu0 %v3795_v4  ;;  %v3880_v8 = vld [vmem:[#allocation5 + $0x40] ss:$16 sps:$4 sm:$0xff]  }
  0xcc   :  { %1690 = vmatprep.subr.bf16.mxu1 %v3798_v5  ;;  %v3949_v4 = vld [vmem:[#allocation5 + $0x2a0] ss:$16 sps:$4 sm:$0xff]   ;;  %v3951_v5 = vld [vmem:[#allocation5 + $0x2a4] ss:$16 sps:$4 sm:$0xff]  }
  0xce   :  { %1666 = vmatpush2.bf16.msra.mxu0 %v3793_v6  ;;  %v3885_v6 = vld [vmem:[#allocation5 + $0x24] ss:$16 sps:$4 sm:$0xff]  }
  0xcf   :  { %1691 = vmatpush1.bf16.msra.mxu1 %v3796_v7  ;;  %1667 = vmatprep.subr.bf16.mxu0 %v3801_v10  ;;  %v3883_v7 = vld [vmem:[#allocation5 + $0x20] ss:$16 sps:$4 sm:$0xff]  }
  0xd0   :  { %1692 = vmatprep.subr.bf16.mxu1 %v3804_v11  ;;  %v3955_v10 = vld [vmem:[#allocation5 + $0x280] ss:$16 sps:$4 sm:$0xff]   ;;  %v3957_v11 = vld [vmem:[#allocation5 + $0x284] ss:$16 sps:$4 sm:$0xff]  }
  0xd2   :  { %1668 = vmatpush2.bf16.msra.mxu0 %v3799_v39  ;;  %v3888_v39 = vld [vmem:[#allocation5 + $0x4] ss:$16 sps:$4 sm:$0xff]  }
  0xd3   :  { %1693 = vmatpush1.bf16.msra.mxu1 %v3802_v12  ;;  %1669 = vmatprep.subr.bf16.mxu0 %v3807_v13  ;;  %v3886_v12 = vld [vmem:[#allocation5] ss:$16 sps:$4 sm:$0xff]  }
  0xd4   :  { %1694 = vmatprep.subr.bf16.mxu1 %v3810_v14  ;;  %v3961_v13 = vld [vmem:[#allocation5 + $0x260] ss:$16 sps:$4 sm:$0xff]   ;;  %v3963_v14 = vld [vmem:[#allocation5 + $0x264] ss:$16 sps:$4 sm:$0xff]  }
  0xd6   :  { %1670 = vmatpush2.bf16.msra.mxu0 %v3805_v15  ;;  %v3891_v15 = vld [vmem:[#allocation5 + $0x1e4] ss:$16 sps:$4 sm:$0xff]  }
  0xd7   :  { %1695 = vmatpush1.bf16.msra.mxu1 %v3808_v16  ;;  %1671 = vmatprep.subr.bf16.mxu0 %v3813_v17  ;;  %v3889_v16 = vld [vmem:[#allocation5 + $0x1e0] ss:$16 sps:$4 sm:$0xff]  }
  0xd8   :  { %1696 = vmatprep.subr.bf16.mxu1 %v3816_v19  ;;  %v3967_v17 = vld [vmem:[#allocation5 + $0x240] ss:$16 sps:$4 sm:$0xff]   ;;  %v3969_v19 = vld [vmem:[#allocation5 + $0x244] ss:$16 sps:$4 sm:$0xff]  }
  0xda   :  { %1672 = vmatpush2.bf16.msra.mxu0 %v3811_v21  ;;  %v3894_v21 = vld [vmem:[#allocation5 + $0x1c4] ss:$16 sps:$4 sm:$0xff]  }
  0xdb   :  { %1697 = vmatpush1.bf16.msra.mxu1 %v3814_v22  ;;  %1723 = vmatprep.subr.bf16.mxu0 %v3822_v24  ;;  %v3892_v24 = vld [vmem:[#allocation5 + $0x1c0] ss:$16 sps:$4 sm:$0xff]  }
  0xdc   :  { %1698 = vmatprep.subr.bf16.mxu1 %v3819_v23 }
  0xdd   :  { %1674 = vmatmul.mubr.bf16.vlgmr.msra.gmra.mxu0 %v4227_v9  ;;  %v3843_v9 = vld [vmem:[#allocation2 + $0x56c] ss:$16 sps:$4 sm:$0xff]  }
  0xde   :  { %1724 = vmatpush1.bf16.msra.mxu0 %v3820_v26  ;;  %1755 = vmatprep.mubr.bf16.mxu0 %v4159_v18  ;;  %v3852_v18 = vld [vmem:[#allocation2 + $0x64c] ss:$16 sps:$4 sm:$0xff]  }
  0xdf   :  { %1699 = vmatpush2.bf16.msra.mxu1 %v3817_v25  ;;  %1725 = vmatprep.subr.bf16.mxu0 %v3828_v28  ;;  %v3975_v28 = vld [vmem:[#allocation5 + $0x224] ss:$16 sps:$4 sm:$0xff]  }
  0xe0   :  { %1700 = vmatprep.subr.bf16.mxu1 %v3825_v27  ;;  %v3897_v27 = vld [vmem:[#allocation5 + $0x1a4] ss:$16 sps:$4 sm:$0xff]  }
  0xe2   :  { %1726 = vmatpush1.bf16.msra.mxu0 %v3826_v30 }
  0xe3   :  { %1701 = vmatpush2.bf16.msra.mxu1 %v3823_v29  ;;  %1727 = vmatprep.subr.bf16.mxu0 %v3834_v32  ;;  %v3973_v29 = vld [vmem:[#allocation5 + $0x220] ss:$16 sps:$4 sm:$0xff]  }
  0xe4   :  { %1702 = vmatprep.subr.bf16.mxu1 %v3831_v31  ;;  %v3895_v32 = vld [vmem:[#allocation5 + $0x1a0] ss:$16 sps:$4 sm:$0xff]  }
  0xe6   :  { %1728 = vmatpush1.bf16.msra.mxu0 %v3832_v34 }
  0xe7   :  { %1703 = vmatpush2.bf16.msra.mxu1 %v3829_v33  ;;  %1729 = vmatprep.subr.bf16.mxu0 %v3840_v36  ;;  %v3979_v36 = vld [vmem:[#allocation5 + $0x200] ss:$16 sps:$4 sm:$0xff]  }
  0xe8   :  { %1704 = vmatprep.subr.bf16.mxu1 %v3837_v35  ;;  %v3900_v35 = vld [vmem:[#allocation5 + $0x184] ss:$16 sps:$4 sm:$0xff]  }
  0xea   :  { %1730 = vmatpush1.bf16.msra.mxu0 %v3838_v52  ;;  %v3898_v52 = vld [vmem:[#allocation5 + $0x180] ss:$16 sps:$4 sm:$0xff]  }
  0xeb   :  { %1705 = vmatpush2.bf16.msra.mxu1 %v3835_v37  ;;  %1731 = vmatprep.subr.bf16.mxu0 %v3846_v38  ;;  %v3981_v37 = vld [vmem:[#allocation5 + $0x204] ss:$16 sps:$4 sm:$0xff]  }
  0xec   :  { %1706 = vmatprep.subr.bf16.mxu1 %v3843_v9  ;;  %v3985_v9 = vld [vmem:[#allocation5 + $0x3e0] ss:$16 sps:$4 sm:$0xff]   ;;  %v3987_v38 = vld [vmem:[#allocation5 + $0x3e4] ss:$16 sps:$4 sm:$0xff]  }
  0xee   :  { %1732 = vmatpush1.bf16.msra.mxu0 %v3844_v41  ;;  %v3990_v41 = vld [vmem:[#allocation5 + $0x3c4] ss:$16 sps:$4 sm:$0xff]  }
  0xef   :  { %1707 = vmatpush2.bf16.msra.mxu1 %v3841_v40  ;;  %1733 = vmatprep.subr.bf16.mxu0 %v3852_v18  ;;  %v3903_v40 = vld [vmem:[#allocation5 + $0x164] ss:$16 sps:$4 sm:$0xff]   ;;  %v3988_v18 = vld [vmem:[#allocation5 + $0x3c0] ss:$16 sps:$4 sm:$0xff]  }
  0xf0   :  { %1708 = vmatprep.subr.bf16.mxu1 %v3849_v42  ;;  %v3901_v42 = vld [vmem:[#allocation5 + $0x160] ss:$16 sps:$4 sm:$0xff]  }
  0xf2   :  { %1734 = vmatpush1.bf16.msra.mxu0 %v3850_v44  ;;  %v3993_v44 = vld [vmem:[#allocation5 + $0x3a4] ss:$16 sps:$4 sm:$0xff]  }
  0xf3   :  { %1709 = vmatpush2.bf16.msra.mxu1 %v3847_v43  ;;  %1735 = vmatprep.subr.bf16.mxu0 %v3858_v46  ;;  %v3906_v43 = vld [vmem:[#allocation5 + $0x144] ss:$16 sps:$4 sm:$0xff]   ;;  %v3991_v46 = vld [vmem:[#allocation5 + $0x3a0] ss:$16 sps:$4 sm:$0xff]  }
  0xf4   :  { %1710 = vmatprep.subr.bf16.mxu1 %v3855_v45  ;;  %v3904_v45 = vld [vmem:[#allocation5 + $0x140] ss:$16 sps:$4 sm:$0xff]  }
  0xf6   :  { %1736 = vmatpush1.bf16.msra.mxu0 %v3856_v50  ;;  %v3996_v50 = vld [vmem:[#allocation5 + $0x384] ss:$16 sps:$4 sm:$0xff]  }
  0xf7   :  { %1711 = vmatpush2.bf16.msra.mxu1 %v3853_v48  ;;  %1737 = vmatprep.subr.bf16.mxu0 %v3864_v53  ;;  %v3909_v48 = vld [vmem:[#allocation5 + $0x124] ss:$16 sps:$4 sm:$0xff]   ;;  %v3994_v53 = vld [vmem:[#allocation5 + $0x380] ss:$16 sps:$4 sm:$0xff]  }
  0xf8   :  { %1712 = vmatprep.subr.bf16.mxu1 %v3861_v51  ;;  %v3907_v51 = vld [vmem:[#allocation5 + $0x120] ss:$16 sps:$4 sm:$0xff]  }
  0xfa   :  { %1738 = vmatpush1.bf16.msra.mxu0 %v3862_v55  ;;  %v3999_v55 = vld [vmem:[#allocation5 + $0x364] ss:$16 sps:$4 sm:$0xff]  }
  0xfb   :  { %1713 = vmatpush2.bf16.msra.mxu1 %v3859_v54  ;;  %2562 = vmatprep.subr.bf16.mxu0 %v3867_v56  ;;  %v3912_v54 = vld [vmem:[#allocation5 + $0x104] ss:$16 sps:$4 sm:$0xff]   ;;  %v3910_v56 = vld [vmem:[#allocation5 + $0x100] ss:$16 sps:$4 sm:$0xff]  }
  0xfc   :  { %2603 = vmatprep.subr.bf16.mxu1 %v3939_v1 }
  0xfd   :  { %1756 = vmatmul.mubr.bf16.vlgmr.msra.gmra.mxu0 %v4241_v47  ;;  %v3945_v47 = vld [vmem:[#allocation5 + $0x2c4] ss:$16 sps:$4 sm:$0xff]  }
  0xfe   :  { %1715 = vmatmul.mubr.bf16.vlgmr.msra.gmra.mxu1 %v4248_v20  ;;  %2563 = vmatpush1.bf16.msra.mxu0 %v3865_v57  ;;  %v3877_v20 = vld [vmem:[#allocation5 + $0x60] ss:$16 sps:$4 sm:$0xff]  }
  0xff   :  { %2564 = vmatprep.subr.bf16.mxu0 %v3870_v58  ;;  %2604 = vmatpush1.bf16.msra.mxu1 %v3937_v0  ;;  %v3997_v57 = vld [vmem:[#allocation5 + $0x360] ss:$16 sps:$4 sm:$0xff]   ;;  %v3915_v58 = vld [vmem:[#allocation5 + $0xec] ss:$16 sps:$4 sm:$0xff]  }
 0x100   :  { %2605 = vmatprep.subr.bf16.mxu1 %v3945_v47  ;;  %v4003_v0 = vld [vmem:[#allocation5 + $0x320] ss:$16 sps:$4 sm:$0xff]   ;;  %v4011_v47 = vld [vmem:[#allocation5 + $0x2ec] ss:$16 sps:$4 sm:$0xff]  }
 0x102   :  { %2565 = vmatpush1.bf16.msra.mxu0 %v3868_v59  ;;  %v4002_v59 = vld [vmem:[#allocation5 + $0x344] ss:$16 sps:$4 sm:$0xff]  }
 0x103   :  { %2566 = vmatprep.subr.bf16.mxu0 %v3873_v60  ;;  %2606 = vmatpush1.bf16.msra.mxu1 %v3943_v2  ;;  %v4000_v60 = vld [vmem:[#allocation5 + $0x340] ss:$16 sps:$4 sm:$0xff]  }
 0x104   :  { %2607 = vmatprep.subr.bf16.mxu1 %v3951_v5  ;;  %v4006_v2 = vld [vmem:[#allocation5 + $0x300] ss:$16 sps:$4 sm:$0xff]  }
 0x105   :  { %v4272_v5 = vld [vmem:[%s4416_s2] sm:$0xf] }
 0x106   :  { %2567 = vmatpush1.bf16.msra.mxu0 %v3871_v61 }
 0x107   :  { %2568 = vmatprep.subr.bf16.mxu0 %v3876_v62  ;;  %2608 = vmatpush1.bf16.msra.mxu1 %v3949_v4 }
 0x108   :  { %2609 = vmatprep.subr.bf16.mxu1 %v3957_v11 }
 0x10a   :  { %2569 = vmatpush1.bf16.msra.mxu0 %v3874_v63  ;;  %v4005_v63 = vld [vmem:[#allocation5 + $0x324] ss:$16 sps:$4 sm:$0xff]  }
 0x10b   :  { %2570 = vmatprep.subr.bf16.mxu0 %v3879_v49  ;;  %2610 = vmatpush1.bf16.msra.mxu1 %v3955_v10 }
 0x10c   :  { %2611 = vmatprep.subr.bf16.mxu1 %v3963_v14 }
 0x10e   :  { %2571 = vmatpush1.bf16.msra.mxu0 %v3877_v20  ;;  %v4008_v20 = vld [vmem:[#allocation5 + $0x304] ss:$16 sps:$4 sm:$0xff]  }
 0x10f   :  { %2572 = vmatprep.subr.bf16.mxu0 %v3882_v3  ;;  %2612 = vmatpush1.bf16.msra.mxu1 %v3961_v13  ;;  %v296_v3 = vlaneseq }
 0x110   :  { %2613 = vmatprep.subr.bf16.mxu1 %v3969_v19 }
 0x112   :  { %2573 = vmatpush1.bf16.msra.mxu0 %v3880_v8  ;;  %v4266_v8 = vshrl.u32 %v296_v3, 7 }
 0x113   :  { %2574 = vmatprep.subr.bf16.mxu0 %v3885_v6  ;;  %2614 = vmatpush1.bf16.msra.mxu1 %v3967_v17 }
 0x114   :  { %2615 = vmatprep.subr.bf16.mxu1 %v3975_v28  ;;  %v298_v4 = vsub.s32 0, %v4266_v8  ;;  %v302_v6 = vsub.s32 1, %v4266_v8 }
 0x116   :  { %2575 = vmatpush1.bf16.msra.mxu0 %v3883_v7  ;;  %v299_v7 = vrot.slane %v4272_v5, %v298_v4  ;;  %v303_v10 = vrot.slane %v4272_v5, %v302_v6 }
 0x117   :  { %2576 = vmatprep.subr.bf16.mxu0 %v3888_v39  ;;  %2616 = vmatpush1.bf16.msra.mxu1 %v3973_v29 }
 0x118   :  { %2617 = vmatprep.subr.bf16.mxu1 %v3981_v37  ;;  %v3930_v37 = vld [vmem:[#allocation5 + $0x4c] ss:$16 sps:$4 sm:$0xff]  }
 0x11a   :  { %2577 = vmatpush1.bf16.msra.mxu0 %v3886_v12 }
 0x11b   :  { %2578 = vmatprep.subr.bf16.mxu0 %v3891_v15  ;;  %2618 = vmatpush1.bf16.msra.mxu1 %v3979_v36  ;;  %v3925_v36 = vld [vmem:[#allocation5 + $0x68] ss:$16 sps:$4 sm:$0xff]  }
 0x11c   :  { %2619 = vmatprep.subr.bf16.mxu1 %v3987_v38 }
 0x11d   :  { %v4258_v22 = vpop.f32.mrf.mxu0 }
 0x11e   :  { %v4260_v23 = vpop.f32.mrf.mxu1  ;;  %2579 = vmatpush2.bf16.msra.mxu0 %v3889_v16  ;;  %v1471_v11 = vadd.f32 %v4258_v22, %v299_v7  ;;  %v3918_v22 = vld [vmem:[#allocation5 + $0xcc] ss:$16 sps:$4 sm:$0xff]  }
 0x11f   :  { %v4262_v25 = vpop.f32.mrf.mxu0  ;;  %2580 = vmatprep.subr.bf16.mxu0 %v3894_v21  ;;  %2620 = vmatpush2.bf16.msra.mxu1 %v3985_v9  ;;  %v3933_v9 = vld [vmem:[#allocation5 + $0x2c] ss:$16 sps:$4 sm:$0xff]  }
 0x120   :  { %v4264_v26 = vpop.f32.mrf.mxu1  ;;  %2621 = vmatprep.subr.bf16.mxu1 %v3990_v41  ;;  %v1473_v39 = vadd.f32 %v4262_v25, %v303_v10  ;;  %v1512_v12 = vadd.f32 %v4260_v23, %v1471_v11  ;;  %v3916_v23 = vld [vmem:[#allocation5 + $0xc8] ss:$16 sps:$4 sm:$0xff]   ;;  %v3921_v25 = vld [vmem:[#allocation5 + $0xac] ss:$16 sps:$4 sm:$0xff]  }
 0x121   :  { %v1474_v30 = vpop.f32.mrf.mxu0 }
 0x122   :  { %v1515_v31 = vpop.f32.mrf.mxu1  ;;  %2581 = vmatpush2.bf16.msra.mxu0 %v3892_v24  ;;  %v1514_v14 = vadd.f32 %v4264_v26, %v1473_v39  ;;  %v3919_v26 = vld [vmem:[#allocation5 + $0xa8] ss:$16 sps:$4 sm:$0xff]  }
 0x123   :  { %v1475_v33 = vpop.f32.mrf.mxu0  ;;  %2582 = vmatprep.subr.bf16.mxu0 %v3897_v27  ;;  %2622 = vmatpush2.bf16.msra.mxu1 %v3988_v18  ;;  %v3913_v31 = vld [vmem:[#allocation5 + $0xe8] ss:$16 sps:$4 sm:$0xff]  }
 0x124   :  { %v1516_v34 = vpop.f32.mrf.mxu1  ;;  %2623 = vmatprep.subr.bf16.mxu1 %v3993_v44  ;;  %v3924_v33 = vld [vmem:[#allocation5 + $0x8c] ss:$16 sps:$4 sm:$0xff]  }
 0x125   :  { %v3922_v34 = vld [vmem:[#allocation5 + $0x88] ss:$16 sps:$4 sm:$0xff]  }
 0x126   :  { %2583 = vmatpush2.bf16.msra.mxu0 %v3895_v32 }
 0x127   :  { %2584 = vmatprep.subr.bf16.mxu0 %v3900_v35  ;;  %2624 = vmatpush2.bf16.msra.mxu1 %v3991_v46  ;;  %v3927_v35 = vld [vmem:[#allocation5 + $0x6c] ss:$16 sps:$4 sm:$0xff]   ;;  %v3940_v46 = vld [vmem:[#allocation5 + $0x1e8] ss:$16 sps:$4 sm:$0xff]  }
 0x128   :  { %2625 = vmatprep.subr.bf16.mxu1 %v3996_v50  ;;  %v3946_v50 = vld [vmem:[#allocation5 + $0x1c8] ss:$16 sps:$4 sm:$0xff]  }
 0x12a   :  { %2585 = vmatpush2.bf16.msra.mxu0 %v3898_v52  ;;  %v3928_v52 = vld [vmem:[#allocation5 + $0x48] ss:$16 sps:$4 sm:$0xff]  }
 0x12b   :  { %2586 = vmatprep.subr.bf16.mxu0 %v3903_v40  ;;  %2626 = vmatpush2.bf16.msra.mxu1 %v3994_v53  ;;  %v3931_v40 = vld [vmem:[#allocation5 + $0x28] ss:$16 sps:$4 sm:$0xff]  }
 0x12c   :  { %2627 = vmatprep.subr.bf16.mxu1 %v3999_v55  ;;  %v3952_v53 = vld [vmem:[#allocation5 + $0x1a8] ss:$16 sps:$4 sm:$0xff]  }
 0x12d   :  { %v3958_v55 = vld [vmem:[#allocation5 + $0x188] ss:$16 sps:$4 sm:$0xff]  }
 0x12e   :  { %2587 = vmatpush2.bf16.msra.mxu0 %v3901_v42  ;;  %v3936_v42 = vld [vmem:[#allocation5 + $0xc] ss:$16 sps:$4 sm:$0xff]  }
 0x12f   :  { %2588 = vmatprep.subr.bf16.mxu0 %v3906_v43  ;;  %2628 = vmatpush2.bf16.msra.mxu1 %v3997_v57  ;;  %v3934_v43 = vld [vmem:[#allocation5 + $0x8] ss:$16 sps:$4 sm:$0xff]  }
 0x130   :  { %2629 = vmatprep.subr.bf16.mxu1 %v4002_v59  ;;  %v3964_v57 = vld [vmem:[#allocation5 + $0x168] ss:$16 sps:$4 sm:$0xff]  }
 0x131   :  { %v3970_v59 = vld [vmem:[#allocation5 + $0x148] ss:$16 sps:$4 sm:$0xff]  }
 0x132   :  { %2589 = vmatpush2.bf16.msra.mxu0 %v3904_v45  ;;  %v3942_v45 = vld [vmem:[#allocation5 + $0x1ec] ss:$16 sps:$4 sm:$0xff]  }
 0x133   :  { %2590 = vmatprep.subr.bf16.mxu0 %v3909_v48  ;;  %2630 = vmatpush2.bf16.msra.mxu1 %v4000_v60  ;;  %v3948_v48 = vld [vmem:[#allocation5 + $0x1cc] ss:$16 sps:$4 sm:$0xff]  }
 0x134   :  { %2631 = vmatprep.subr.bf16.mxu1 %v4005_v63  ;;  %v3978_v60 = vld [vmem:[#allocation5 + $0x12c] ss:$16 sps:$4 sm:$0xff]  }
 0x136   :  { %2591 = vmatpush2.bf16.msra.mxu0 %v3907_v51  ;;  %v3954_v51 = vld [vmem:[#allocation5 + $0x1ac] ss:$16 sps:$4 sm:$0xff]  }
 0x137   :  { %2592 = vmatprep.subr.bf16.mxu0 %v3912_v54  ;;  %2632 = vmatpush2.bf16.msra.mxu1 %v4003_v0  ;;  %v3960_v54 = vld [vmem:[#allocation5 + $0x18c] ss:$16 sps:$4 sm:$0xff]  }
 0x138   :  { %2633 = vmatprep.subr.bf16.mxu1 %v4008_v20  ;;  %v3984_v0 = vld [vmem:[#allocation5 + $0x10c] ss:$16 sps:$4 sm:$0xff]  }
 0x13a   :  { %2593 = vmatpush2.bf16.msra.mxu0 %v3910_v56  ;;  %v3966_v56 = vld [vmem:[#allocation5 + $0x16c] ss:$16 sps:$4 sm:$0xff]  }
 0x13b   :  { %2644 = vmatprep.subr.bf16.mxu0 %v3915_v58  ;;  %2634 = vmatpush2.bf16.msra.mxu1 %v4006_v2  ;;  %v3972_v58 = vld [vmem:[#allocation5 + $0x14c] ss:$16 sps:$4 sm:$0xff]   ;;  %v306_v2 = vsub.s32 2, %v4266_v8 }
 0x13c   :  { %2685 = vmatprep.subr.bf16.mxu1 %v4011_v47  ;;  %v310_v47 = vsub.s32 3, %v4266_v8 }
 0x13d   :  { %v307_v3 = vrot.slane %v4272_v5, %v306_v2 }
 0x13e   :  { %v1593_v61 = vpop.f32.mrf.mxu1  ;;  %v311_v7 = vrot.slane %v4272_v5, %v310_v47  ;;  %v4009_v5 = vld [vmem:[#allocation5 + $0x2e8] ss:$16 sps:$4 sm:$0xff]  }
 0x140   :  { %v1595_v62 = vpop.f32.mrf.mxu1 }
 0x142   :  { %v1597_v1 = vpop.f32.mrf.mxu1 }
 0x144   :  { %v1598_v49 = vpop.f32.mrf.mxu1 }
 0x145   :  { %v3982_v49 = vld [vmem:[#allocation5 + $0x108] ss:$16 sps:$4 sm:$0xff]  }
 0x15d   :  { %v1552_v13 = vpop.f32.mrf.mxu0 }
 0x15e   :  { %v1553_v15 = vadd.f32 %v1552_v13, %v1512_v12 }
 0x15f   :  { %v1554_v16 = vpop.f32.mrf.mxu0 }
 0x160   :  { %v1594_v17 = vadd.f32 %v1593_v61, %v1553_v15  ;;  %v1555_v19 = vadd.f32 %v1554_v16, %v1514_v14 }
 0x161   :  { %v1556_v21 = vpop.f32.mrf.mxu0 }
 0x162   :  { %v1596_v24 = vadd.f32 %v1595_v62, %v1555_v19  ;;  %v1764_v27 = vmax.f32 %v1594_v17, 0.0  ;;  %v3976_v62 = vld [vmem:[#allocation5 + $0x128] ss:$16 sps:$4 sm:$0xff]  }
 0x163   :  { %v1557_v28 = vpop.f32.mrf.mxu0 }
 0x164   :  { %v1765_v29 = vmax.f32 %v1596_v24, 0.0  ;;  %v4285_v32 = vpack.c.bf16 %v1764_v27, %v1764_v27 }
 0x166   :  { %v1769_v30 = vpack.c.bf16 %v1765_v29, %v1765_v29 }
 0x168   :  { %2594 = vmatprep.mubr.bf16.mxu0 %v1769_v30 }
 0x169   :  { %2595 = vmatmul.mubr.bf16.vlgmr.msra.gmra.mxu0 %v4285_v32 }
 0x16a   :  { %2645 = vmatpush1.bf16.msra.mxu0 %v3913_v31  ;;  %2676 = vmatprep.mubr.bf16.mxu0 %v1769_v30 }
 0x16b   :  { %2646 = vmatprep.subr.bf16.mxu0 %v3918_v22 }
 0x16e   :  { %2647 = vmatpush1.bf16.msra.mxu0 %v3916_v23 }
 0x16f   :  { %2648 = vmatprep.subr.bf16.mxu0 %v3921_v25  ;;  %v4014_v25 = vld [vmem:[#allocation5 + $0x2cc] ss:$16 sps:$4 sm:$0xff]  }
 0x172   :  { %2649 = vmatpush1.bf16.msra.mxu0 %v3919_v26  ;;  %v4012_v26 = vld [vmem:[#allocation5 + $0x2c8] ss:$16 sps:$4 sm:$0xff]  }
 0x173   :  { %2650 = vmatprep.subr.bf16.mxu0 %v3924_v33  ;;  %v4017_v33 = vld [vmem:[#allocation5 + $0x2ac] ss:$16 sps:$4 sm:$0xff]  }
 0x176   :  { %2651 = vmatpush1.bf16.msra.mxu0 %v3922_v34  ;;  %v4015_v34 = vld [vmem:[#allocation5 + $0x2a8] ss:$16 sps:$4 sm:$0xff]  }
 0x177   :  { %2652 = vmatprep.subr.bf16.mxu0 %v3927_v35  ;;  %v4020_v35 = vld [vmem:[#allocation5 + $0x28c] ss:$16 sps:$4 sm:$0xff]  }
 0x17a   :  { %2653 = vmatpush1.bf16.msra.mxu0 %v3925_v36  ;;  %v4018_v36 = vld [vmem:[#allocation5 + $0x288] ss:$16 sps:$4 sm:$0xff]  }
 0x17b   :  { %2654 = vmatprep.subr.bf16.mxu0 %v3930_v37  ;;  %v4023_v37 = vld [vmem:[#allocation5 + $0x26c] ss:$16 sps:$4 sm:$0xff]  }
 0x17e   :  { %v1634_v38 = vpop.f32.mrf.mxu1  ;;  %2655 = vmatpush1.bf16.msra.mxu0 %v3928_v52  ;;  %v4021_v52 = vld [vmem:[#allocation5 + $0x268] ss:$16 sps:$4 sm:$0xff]  }
 0x17f   :  { %2656 = vmatprep.subr.bf16.mxu0 %v3933_v9  ;;  %v1635_v10 = vadd.f32 %v1634_v38, %v307_v3  ;;  %v4026_v9 = vld [vmem:[#allocation5 + $0x24c] ss:$16 sps:$4 sm:$0xff]   ;;  %v4024_v38 = vld [vmem:[#allocation5 + $0x248] ss:$16 sps:$4 sm:$0xff]  }
 0x180   :  { %v1636_v41 = vpop.f32.mrf.mxu1  ;;  %v4051_v3 = vld [vmem:[#allocation5 + $0x328] ss:$16 sps:$4 sm:$0xff]  }
 0x181   :  { %v1637_v11 = vadd.f32 %v1636_v41, %v311_v7  ;;  %v4027_v41 = vld [vmem:[#allocation5 + $0x228] ss:$16 sps:$4 sm:$0xff]  }
 0x182   :  { %v1638_v18 = vpop.f32.mrf.mxu1  ;;  %2657 = vmatpush1.bf16.msra.mxu0 %v3931_v40  ;;  %v4029_v40 = vld [vmem:[#allocation5 + $0x22c] ss:$16 sps:$4 sm:$0xff]  }
 0x183   :  { %2658 = vmatprep.subr.bf16.mxu0 %v3936_v42  ;;  %v4032_v42 = vld [vmem:[#allocation5 + $0x20c] ss:$16 sps:$4 sm:$0xff]   ;;  %v4030_v18 = vld [vmem:[#allocation5 + $0x208] ss:$16 sps:$4 sm:$0xff]  }
 0x184   :  { %v1639_v44 = vpop.f32.mrf.mxu1  ;;  %v4066_v7 = vld [vmem:[%s4419_s5 + $0x18] sm:$0xff]  }
 0x185   :  { %v4033_v44 = vld [vmem:[#allocation5 + $0x3e8] ss:$16 sps:$4 sm:$0xff]  }
 0x186   :  { %2659 = vmatpush1.bf16.msra.mxu0 %v3934_v43  ;;  %v4035_v43 = vld [vmem:[#allocation5 + $0x3ec] ss:$16 sps:$4 sm:$0xff]  }
 0x187   :  { %2660 = vmatprep.subr.bf16.mxu0 %v3942_v45  ;;  %v4038_v45 = vld [vmem:[#allocation5 + $0x3cc] ss:$16 sps:$4 sm:$0xff]  }
 0x18a   :  { %2661 = vmatpush2.bf16.msra.mxu0 %v3940_v46  ;;  %v4036_v46 = vld [vmem:[#allocation5 + $0x3c8] ss:$16 sps:$4 sm:$0xff]  }
 0x18b   :  { %2662 = vmatprep.subr.bf16.mxu0 %v3948_v48  ;;  %v4041_v48 = vld [vmem:[#allocation5 + $0x3ac] ss:$16 sps:$4 sm:$0xff]  }
 0x18e   :  { %2663 = vmatpush2.bf16.msra.mxu0 %v3946_v50  ;;  %v4039_v50 = vld [vmem:[#allocation5 + $0x3a8] ss:$16 sps:$4 sm:$0xff]  }
 0x18f   :  { %2664 = vmatprep.subr.bf16.mxu0 %v3954_v51  ;;  %v4044_v51 = vld [vmem:[#allocation5 + $0x38c] ss:$16 sps:$4 sm:$0xff]  }
 0x192   :  { %2665 = vmatpush2.bf16.msra.mxu0 %v3952_v53  ;;  %v4057_v53 = vld [vmem:[%s4419_s5 + $0x78] sm:$0xff]  }
 0x193   :  { %2666 = vmatprep.subr.bf16.mxu0 %v3960_v54  ;;  %v4058_v54 = vld [vmem:[%s4419_s5 + $0x38] sm:$0xff]  }
 0x196   :  { %2667 = vmatpush2.bf16.msra.mxu0 %v3958_v55  ;;  %v4059_v55 = vld [vmem:[%s4419_s5 + $0x70] sm:$0xff]  }
 0x197   :  { %2668 = vmatprep.subr.bf16.mxu0 %v3966_v56  ;;  %v4042_v56 = vld [vmem:[#allocation5 + $0x388] ss:$16 sps:$4 sm:$0xff]  }
 0x19a   :  { %2669 = vmatpush2.bf16.msra.mxu0 %v3964_v57  ;;  %v4060_v57 = vld [vmem:[%s4419_s5 + $0x30] sm:$0xff]  }
 0x19b   :  { %2670 = vmatprep.subr.bf16.mxu0 %v3972_v58  ;;  %v4047_v58 = vld [vmem:[#allocation5 + $0x36c] ss:$16 sps:$4 sm:$0xff]  }
 0x19d   :  { %v1675_v61 = vpop.f32.mrf.mxu0 }
 0x19e   :  { %2671 = vmatpush2.bf16.msra.mxu0 %v3970_v59  ;;  %v1676_v39 = vadd.f32 %v1675_v61, %v1635_v10  ;;  %v4061_v59 = vld [vmem:[%s4419_s5 + $0x68] sm:$0xff]  }
 0x19f   :  { %v1677_v63 = vpop.f32.mrf.mxu0  ;;  %2672 = vmatprep.subr.bf16.mxu0 %v3978_v60  ;;  %v4045_v60 = vld [vmem:[#allocation5 + $0x368] ss:$16 sps:$4 sm:$0xff]   ;;  %v4056_v10 = vld [vmem:[#allocation5 + $0x30c] ss:$16 sps:$4 sm:$0xff]  }
 0x1a0   :  { %v1678_v14 = vadd.f32 %v1677_v63, %v1637_v11  ;;  %v4062_v61 = vld [vmem:[%s4419_s5 + $0x28] sm:$0xff]   ;;  %v4063_v63 = vld [vmem:[%s4419_s5 + $0x60] sm:$0xff]   ;;  %v4067_v11 = vld [vmem:[%s4419_s5 + $0x50] sm:$0xff]  }
 0x1a1   :  { %v1679_v1 = vpop.f32.mrf.mxu0 }
 0x1a2   :  { %2673 = vmatpush2.bf16.msra.mxu0 %v3976_v62  ;;  %v4050_v62 = vld [vmem:[#allocation5 + $0x34c] ss:$16 sps:$4 sm:$0xff]   ;;  %v4064_v1 = vld [vmem:[%s4419_s5 + $0x20] sm:$0xff]  }
 0x1a3   :  { %v1680_v20 = vpop.f32.mrf.mxu0  ;;  %2674 = vmatprep.subr.bf16.mxu0 %v3984_v0  ;;  %v4048_v0 = vld [vmem:[#allocation5 + $0x348] ss:$16 sps:$4 sm:$0xff]  }
 0x1a4   :  { %v4065_v20 = vld [vmem:[%s4419_s5 + $0x58] sm:$0xff]  }
 0x1a6   :  { %2675 = vmatpush2.bf16.msra.mxu0 %v3982_v49  ;;  %v4053_v49 = vld [vmem:[#allocation5 + $0x32c] ss:$16 sps:$4 sm:$0xff]  }
 0x1a7   :  { %3479 = vmatprep.subr.bf16.mxu0 %v4057_v53 }
 0x1a9   :  { %2677 = vmatmul.mubr.bf16.vlgmr.msra.gmra.mxu0 %v4285_v32 }
 0x1aa   :  { %3480 = vmatpush3.bf16.msra.mxu0 %v4058_v54 }
 0x1ab   :  { %3481 = vmatprep.subr.bf16.mxu0 %v4059_v55 }
 0x1ae   :  { %3482 = vmatpush3.bf16.msra.mxu0 %v4060_v57 }
 0x1af   :  { %3483 = vmatprep.subr.bf16.mxu0 %v4061_v59 }
 0x1b2   :  { %3484 = vmatpush3.bf16.msra.mxu0 %v4062_v61 }
 0x1b3   :  { %3485 = vmatprep.subr.bf16.mxu0 %v4063_v63 }
 0x1b6   :  { %3486 = vmatpush3.bf16.msra.mxu0 %v4064_v1 }
 0x1b7   :  { %3487 = vmatprep.subr.bf16.mxu0 %v4065_v20 }
 0x1ba   :  { %3488 = vmatpush3.bf16.msra.mxu0 %v4066_v7 }
 0x1bb   :  { %3489 = vmatprep.subr.bf16.mxu0 %v4067_v11 }
 0x1bd   :  { %v1757_v13 = vpop.f32.mrf.mxu0 }
 0x1be   :  { %v1716_v12 = vpop.f32.mrf.mxu1 }
 0x1bf   :  { %v1717_v15 = vadd.f32 %v1716_v12, %v1676_v39  ;;  %v1759_v17 = vpop.f32.mrf.mxu0  ;;  %v4054_v39 = vld [vmem:[#allocation5 + $0x308] ss:$16 sps:$4 sm:$0xff]   ;;  %v4068_v12 = vld [vmem:[%s4419_s5 + $0x10] sm:$0xff]  }
 0x1c0   :  { %v1718_v16 = vpop.f32.mrf.mxu1  ;;  %3490 = vmatpush3.bf16.msra.mxu0 %v4068_v12 }
 0x1c1   :  { %v1758_v19 = vadd.f32 %v1757_v13, %v1717_v15  ;;  %v1719_v21 = vadd.f32 %v1718_v16, %v1678_v14  ;;  %v1761_v27 = vpop.f32.mrf.mxu0  ;;  %v4069_v13 = vld [vmem:[%s4419_s5 + $0x48] sm:$0xff]   ;;  %v4071_v15 = vld [vmem:[%s4419_s5 + $0x40] sm:$0xff]  }
 0x1c2   :  { %v1720_v24 = vpop.f32.mrf.mxu1  ;;  %v4070_v14 = vld [vmem:[%s4419_s5 + $0x8] sm:$0xff]   ;;  %3491 = vmatprep.subr.bf16.mxu0 %v4069_v13  ;;  %v4072_v16 = vld [vmem:[%s4419_s5] sm:$0xff]  }
 0x1c3   :  { %v1760_v28 = vadd.f32 %v1759_v17, %v1719_v21  ;;  %v1766_v29 = vmax.f32 %v1758_v19, 0.0  ;;  %v1762_v31 = vpop.f32.mrf.mxu0  ;;  %v4073_v17 = vld [vmem:[%s4419_s5 + $0xf8] sm:$0xff]   ;;  %v4075_v21 = vld [vmem:[%s4419_s5 + $0xf0] sm:$0xff]   ;;  %v4077_v27 = vld [vmem:[%s4419_s5 + $0xe8] sm:$0xff]  }
 0x1c4   :  { %v1721_v30 = vpop.f32.mrf.mxu1  ;;  %3492 = vmatpush3.bf16.msra.mxu0 %v4070_v14  ;;  %v4074_v19 = vld [vmem:[%s4419_s5 + $0xb8] sm:$0xff]   ;;  %v4076_v24 = vld [vmem:[%s4419_s5 + $0xb0] sm:$0xff]  }
 0x1c5   :  { %v1767_v32 = vmax.f32 %v1760_v28, 0.0  ;;  %v4297_v23 = vpack.c.bf16 %v1766_v29, %v1766_v29  ;;  %3493 = vmatprep.subr.bf16.mxu0 %v4071_v15  ;;  %v4078_v28 = vld [vmem:[%s4419_s5 + $0xa8] sm:$0xff]   ;;  %v4079_v29 = vld [vmem:[%s4419_s5 + $0xe0] sm:$0xff]   ;;  %v4081_v31 = vld [vmem:[%s4419_s5 + $0xd8] sm:$0xff]  }
 0x1c6   :  { %v4080_v30 = vld [vmem:[%s4419_s5 + $0xa0] sm:$0xff]  }
 0x1c7   :  { %v1771_v22 = vpack.c.bf16 %v1767_v32, %v1767_v32  ;;  %v4082_v32 = vld [vmem:[%s4419_s5 + $0x98] sm:$0xff]  }
 0x1c8   :  { %3494 = vmatpush3.bf16.msra.mxu0 %v4072_v16 }
 0x1c9   :  { %2635 = vmatprep.mubr.bf16.mxu1 %v1771_v22 }
 0x1ca   :  { %2636 = vmatmul.mubr.bf16.vlgmr.msra.gmra.mxu1 %v4297_v23 }
 0x1cb   :  { %2686 = vmatpush1.bf16.msra.mxu1 %v4009_v5  ;;  %2717 = vmatprep.mubr.bf16.mxu1 %v1771_v22  ;;  %v4083_v22 = vld [vmem:[%s4419_s5 + $0xd0] sm:$0xff]  }
 0x1cc   :  { %2687 = vmatprep.subr.bf16.mxu1 %v4014_v25  ;;  %v4084_v5 = vld [vmem:[%s4419_s5 + $0x90] sm:$0xff]  }
 0x1cf   :  { %2688 = vmatpush1.bf16.msra.mxu1 %v4012_v26 }
 0x1d0   :  { %2689 = vmatprep.subr.bf16.mxu1 %v4017_v33 }
 0x1d3   :  { %2690 = vmatpush1.bf16.msra.mxu1 %v4015_v34  ;;  %v4085_v34 = vld [vmem:[%s4419_s5 + $0xc8] sm:$0xff]  }
 0x1d4   :  { %2691 = vmatprep.subr.bf16.mxu1 %v4020_v35  ;;  %v4086_v35 = vld [vmem:[%s4419_s5 + $0x88] sm:$0xff]  }
 0x1d7   :  { %2692 = vmatpush1.bf16.msra.mxu1 %v4018_v36  ;;  %v4087_v36 = vld [vmem:[%s4419_s5 + $0xc0] sm:$0xff]  }
 0x1d8   :  { %2693 = vmatprep.subr.bf16.mxu1 %v4023_v37  ;;  %v4088_v37 = vld [vmem:[%s4419_s5 + $0x80] sm:$0xff]  }
 0x1db   :  { %2694 = vmatpush1.bf16.msra.mxu1 %v4021_v52 }
 0x1dc   :  { %2695 = vmatprep.subr.bf16.mxu1 %v4026_v9 }
 0x1df   :  { %2696 = vmatpush1.bf16.msra.mxu1 %v4024_v38 }
 0x1e0   :  { %2697 = vmatprep.subr.bf16.mxu1 %v4029_v40 }
 0x1e3   :  { %2698 = vmatpush1.bf16.msra.mxu1 %v4027_v41  ;;  %v1900_v41 = vld [vmem:[%s4418_s4] sm:$0xf] }
 0x1e4   :  { %2699 = vmatprep.subr.bf16.mxu1 %v4032_v42  ;;  %v1905_v42 = vrot.slane %v1900_v41, %v298_v4  ;;  %v1913_v4 = vrot.slane %v1900_v41, %v306_v2 }
 0x1e7   :  { %2700 = vmatpush1.bf16.msra.mxu1 %v4030_v18  ;;  %v1909_v18 = vrot.slane %v1900_v41, %v302_v6  ;;  %v1917_v6 = vrot.slane %v1900_v41, %v310_v47  ;;  %v3446_v47 = vld [vmem:[%s4420_s6] ss:$0 sm:$0xff] }
 0x1e8   :  { %2701 = vmatprep.subr.bf16.mxu1 %v4035_v43 }
 0x1eb   :  { %2702 = vmatpush2.bf16.msra.mxu1 %v4033_v44 }
 0x1ec   :  { %2703 = vmatprep.subr.bf16.mxu1 %v4038_v45 }
 0x1ef   :  { %2704 = vmatpush2.bf16.msra.mxu1 %v4036_v46 }
 0x1f0   :  { %2705 = vmatprep.subr.bf16.mxu1 %v4041_v48 }
 0x1f3   :  { %2706 = vmatpush2.bf16.msra.mxu1 %v4039_v50 }
 0x1f4   :  { %2707 = vmatprep.subr.bf16.mxu1 %v4044_v51 }
 0x1f7   :  { %2708 = vmatpush2.bf16.msra.mxu1 %v4042_v56 }
 0x1f8   :  { %2709 = vmatprep.subr.bf16.mxu1 %v4047_v58 }
 0x1fb   :  { %2710 = vmatpush2.bf16.msra.mxu1 %v4045_v60 }
 0x1fc   :  { %2711 = vmatprep.subr.bf16.mxu1 %v4050_v62 }
 0x1ff   :  { %2712 = vmatpush2.bf16.msra.mxu1 %v4048_v0 }
 0x200   :  { %2713 = vmatprep.subr.bf16.mxu1 %v4053_v49 }
 0x203   :  { %2714 = vmatpush2.bf16.msra.mxu1 %v4051_v3 }
 0x204   :  { %2715 = vmatprep.subr.bf16.mxu1 %v4056_v10 }
 0x207   :  { %2716 = vmatpush2.bf16.msra.mxu1 %v4054_v39 }
 0x208   :  { %3501 = vmatprep.subr.bf16.mxu1 %v4073_v17 }
 0x20a   :  { %2718 = vmatmul.mubr.bf16.vlgmr.msra.gmra.mxu1 %v4297_v23 }
 0x20b   :  { %3502 = vmatpush3.bf16.msra.mxu1 %v4074_v19 }
 0x20c   :  { %3503 = vmatprep.subr.bf16.mxu1 %v4075_v21 }
 0x20f   :  { %3504 = vmatpush3.bf16.msra.mxu1 %v4076_v24 }
 0x210   :  { %3505 = vmatprep.subr.bf16.mxu1 %v4077_v27 }
 0x213   :  { %3506 = vmatpush3.bf16.msra.mxu1 %v4078_v28 }
 0x214   :  { %3507 = vmatprep.subr.bf16.mxu1 %v4079_v29 }
 0x217   :  { %3508 = vmatpush3.bf16.msra.mxu1 %v4080_v30 }
 0x218   :  { %3509 = vmatprep.subr.bf16.mxu1 %v4081_v31 }
 0x21b   :  { %3510 = vmatpush3.bf16.msra.mxu1 %v4082_v32 }
 0x21c   :  { %3511 = vmatprep.subr.bf16.mxu1 %v4083_v22 }
 0x21f   :  { %3512 = vmatpush3.bf16.msra.mxu1 %v4084_v5 }
 0x220   :  { %3513 = vmatprep.subr.bf16.mxu1 %v4085_v34 }
 0x223   :  { %3514 = vmatpush3.bf16.msra.mxu1 %v4086_v35 }
 0x224   :  { %3515 = vmatprep.subr.bf16.mxu1 %v4087_v36 }
 0x227   :  { %3516 = vmatpush3.bf16.msra.mxu1 %v4088_v37 }
 0x229   :  { %v2596_v23 = vpop.f32.mrf.mxu0 }
 0x22a   :  { %v2597_v43 = vadd.f32 %v2596_v23, %v1905_v42 }
 0x22b   :  { %v2598_v25 = vpop.f32.mrf.mxu0 }
 0x22c   :  { %v2599_v45 = vadd.f32 %v2598_v25, %v1909_v18 }
 0x22d   :  { %v2600_v26 = vpop.f32.mrf.mxu0 }
 0x22f   :  { %v2601_v33 = vpop.f32.mrf.mxu0 }
 0x269   :  { %v2678_v52 = vpop.f32.mrf.mxu0 }
 0x26a   :  { %v2679_v58 = vadd.f32 %v2678_v52, %v1913_v4 }
 0x26b   :  { %v2680_v9 = vpop.f32.mrf.mxu0 }
 0x26c   :  { %v2681_v60 = vadd.f32 %v2680_v9, %v1917_v6 }
 0x26d   :  { %v2682_v38 = vpop.f32.mrf.mxu0 }
 0x26f   :  { %v2683_v40 = vpop.f32.mrf.mxu0 }
 0x28a   :  { %v2637_v44 = vpop.f32.mrf.mxu1 }
 0x28b   :  { %v2638_v46 = vadd.f32 %v2637_v44, %v2597_v43 }
 0x28c   :  { %v2639_v48 = vpop.f32.mrf.mxu1 }
 0x28d   :  { %v2640_v50 = vadd.f32 %v2639_v48, %v2599_v45  ;;  %v2726_v51 = vmax.f32 %v2638_v46, 0.0 }
 0x28e   :  { %v2641_v53 = vpop.f32.mrf.mxu1 }
 0x28f   :  { %v2727_v54 = vmax.f32 %v2640_v50, 0.0  ;;  %v2730_v57 = vpack.c.bf16 %v2726_v51, %v2726_v51 }
 0x290   :  { %v2642_v55 = vpop.f32.mrf.mxu1 }
 0x291   :  { %v2731_v56 = vpack.c.bf16 %v2727_v54, %v2727_v54 }
 0x293   :  { %3029 = vmatprep.mubr.bf16.mxu0 %v2731_v56 }
 0x294   :  { %3030 = vmatmul.mubr.bf16.vlgmr.msra.gmra.mxu0 %v2730_v57 }
 0x2ca   :  { %v2719_v59 = vpop.f32.mrf.mxu1 }
 0x2cb   :  { %v2720_v61 = vadd.f32 %v2719_v59, %v2679_v58 }
 0x2cc   :  { %v2721_v62 = vpop.f32.mrf.mxu1 }
 0x2cd   :  { %v2722_v63 = vadd.f32 %v2721_v62, %v2681_v60  ;;  %v2728_v0 = vmax.f32 %v2720_v61, 0.0 }
 0x2ce   :  { %v2723_v1 = vpop.f32.mrf.mxu1 }
 0x2cf   :  { %v2729_v49 = vmax.f32 %v2722_v63, 0.0  ;;  %v2732_v7 = vpack.c.bf16 %v2728_v0, %v2728_v0 }
 0x2d0   :  { %v2724_v20 = vpop.f32.mrf.mxu1 }
 0x2d1   :  { %v2733_v3 = vpack.c.bf16 %v2729_v49, %v2729_v49 }
 0x2d3   :  { %3069 = vmatprep.mubr.bf16.mxu1 %v2733_v3 }
 0x2d4   :  { %3070 = vmatmul.mubr.bf16.vlgmr.msra.gmra.mxu1 %v2732_v7 }
 0x354   :  { %v3495_v10 = vpop.f32.mrf.mxu0 }
 0x356   :  { %v3496_v11 = vpop.f32.mrf.mxu0 }
 0x357   :  { %v3497_v8 = vadd.f32 %v3496_v11, %v3495_v10 }
 0x358   :  { %v3498_v2 = vpop.f32.mrf.mxu0 }
 0x359   :  { %v3032_v14 = vadd.f32 %v3497_v8, %v3446_v47 }
 0x35a   :  { %v3499_v39 = vpop.f32.mrf.mxu0 }
 0x394   :  { %v3517_v12 = vpop.f32.mrf.mxu1 }
 0x396   :  { %v3518_v13 = vpop.f32.mrf.mxu1 }
 0x397   :  { %v3519_v15 = vadd.f32 %v3518_v13, %v3517_v12 }
 0x398   :  { %v3520_v16 = vpop.f32.mrf.mxu1 }
 0x399   :  { %v3072_v17 = vadd.f32 %v3519_v15, %v3032_v14 }
 0x39a   :  { %v3521_v19 = vpop.f32.mrf.mxu1 }
 0x39b   :  { %3077 = vst [vmem:[#allocation7] sm:$0xff] %v3072_v17 }
 0x39c   :  { %4140 = shalt.err (!%p4137_p0)
}
 0x39d   :  { %3087 = dma.vmem_to_hbm [thread:$0]  %s3085_s13, 128, %s4421_s7, [#allocation4]  }
 0x39e   :  { %4153 = dma.done.wait [#allocation4], 128  }
 0x39f   :  { %4154 = vsyncadd [#allocation4], 4294967168 }
 0x3a0   :  { %3091 = vsyncpa [#allocation3], 1 }
 0x3a1   :  { %3092 = vsyncpa [#allocation6], 1 }
 0x3a2   :  { %3093 = vsyncpa [#allocation4], 1 }

</bundles_post_ra>
